<compile_context>
chip_gen: v5e
topology: v5e:2x2
jax: 0.10.0
libtpu: 0.0.40
codegen_flags: <defaults>
</compile_context>

<pallas_src>
import functools
import math

import jax
import jax.numpy as jnp
from jax.experimental import pallas as pl
from jax.experimental.pallas import tpu as pltpu


# Scoped-VMEM budget: above the 16/32 MiB defaults, below v7x's 64 MiB/TC physical.
# TODO(synk): raise to ~100 MiB on v5e/v6e (128 MiB physical) via pltpu.get_tpu_info().
_VMEM_LIMIT_BYTES = 48 * 1024 * 1024

_MATMUL_DTYPE = jnp.bfloat16      # MXU operand dtype (f32 accumulation everywhere)

_DEC_WEIGHT_NAMES = (
    "dn_g", "dn_b",
    "sa_qkv_w", "sa_qkv_b", "sa_o_w", "sa_o_b",
    "n1_g", "n1_b",
    "ca_q_w", "ca_q_b", "ca_kv_w", "ca_kv_b", "ca_o_w", "ca_o_b",
    "n2_g", "n2_b",
    "ff1_w", "ff1_b", "ff2_w", "ff2_b",
)


# ----------------------------------------------------------------------------
# tiling helpers
# ----------------------------------------------------------------------------

def _pick_row_block(m, cap=256):
    """Largest multiple-of-8 divisor of m (capped); full m if not 8-aligned."""
    if m % 8 != 0:
        return m
    bm = min(m, cap)
    while m % bm != 0:
        bm -= 8
    return bm


def _pick_col_block(n, cap=1024):
    """Largest multiple-of-128 divisor of n (capped); full n if not 128-aligned."""
    if n % 128 != 0:
        return n
    bn = min(n, cap)
    while n % bn != 0:
        bn -= 128
    return bn


# ----------------------------------------------------------------------------
# fused decoder stack kernel: grid = (batch, layer), activation resident in VMEM
# ----------------------------------------------------------------------------

def _decoder_stack_kernel(*refs, heads, head_dim, causal):
    # refs: x, enc, src_mask, [trg_mask,] 20 stacked weights, out, act_scratch
    x_ref, enc_ref, smask_ref = refs[0], refs[1], refs[2]
    pos = 3
    tmask_ref = None
    if not causal:
        tmask_ref = refs[pos]
        pos += 1
    w_refs = refs[pos:pos + len(_DEC_WEIGHT_NAMES)]
    pos += len(_DEC_WEIGHT_NAMES)
    o_ref = refs[pos]
    act_ref = refs[pos + 1]
    W = dict(zip(_DEC_WEIGHT_NAMES, w_refs))

    f32 = jnp.float32
    cdt = _MATMUL_DTYPE
    l = pl.program_id(1)
    n_layers = pl.num_programs(1)

    # Load the embedding activations once per batch element (layer 0 only).
    @pl.when(l == 0)
    def _():
        act_ref[...] = x_ref[0].astype(f32)

    x = act_ref[...]                          # (L, E) f32 residual stream
    enc = enc_ref[0].astype(f32)              # (Ls, E)
    smask_keep = smask_ref[0, 0] != 0         # (1, Ls) bool
    L, E = x.shape

    if causal:
        # In-kernel causal mask: no O(N*L^2) HBM mask traffic (VPU iota+compare).
        row = jax.lax.broadcasted_iota(jnp.int32, (L, L), 0)
        col = jax.lax.broadcasted_iota(jnp.int32, (L, L), 1)
        tmask_keep = row >= col
    else:
        tmask_keep = tmask_ref[0, 0] != 0     # (L, L) bool

    def w2(name):                              # 2-D view of this layer's weight block
        return W[name][0]

    def ln(v, g, b):                           # nn.LayerNorm(E), eps=1e-5, biased var
        mu = jnp.mean(v, axis=-1, keepdims=True)
        c = v - mu
        var = jnp.mean(c * c, axis=-1, keepdims=True)
        return c * jax.lax.rsqrt(var + 1e-5) * g + b

    def mha(q, k, v, keep, o_w, o_b):
        # q: (Lq, E) f32 (1/sqrt(head_dim) already folded into the Q projection),
        # k, v: (Lk, E) f32, keep: bool mask broadcastable to (Lq, Lk).
        # Per-head scores/PV matmuls (static unroll), then ONE (Lq,E)@(E,E) output
        # projection so the big matmul contracts over E, not head_dim.
        # TODO(synk): for production configs pad head_dim to 128 (lane-aligned head
        # slices) and/or batch heads via a leading-batch einsum + flash-style K tiling.
        head_outs = []
        for h in range(heads):
            lo = h * head_dim
            hi = lo + head_dim
            qh = q[:, lo:hi].astype(cdt)
            kh = k[:, lo:hi].astype(cdt)
            vh = v[:, lo:hi].astype(cdt)
            e = jax.lax.dot_general(qh, kh, (((1,), (1,)), ((), ())),
                                    preferred_element_type=f32)        # (Lq, Lk)
            e = jnp.where(keep, e, f32(-1e20))                          # masked_fill
            e = e - jnp.max(e, axis=-1, keepdims=True)
            p = jnp.exp(e)
            p = p / jnp.sum(p, axis=-1, keepdims=True)                  # exact softmax
            head_outs.append(jnp.dot(p.astype(cdt), vh,
                                     preferred_element_type=f32))       # (Lq, hd)
        cat = jnp.concatenate(head_outs, axis=-1)                        # (Lq, E)
        return jnp.dot(cat.astype(cdt), o_w, preferred_element_type=f32) + o_b

    # --- masked self-attention over the target sequence (pre-LN, as in the ref) ---
    xn = ln(x, w2("dn_g"), w2("dn_b"))
    qkv = jnp.dot(xn.astype(cdt), w2("sa_qkv_w"),
                  preferred_element_type=f32) + w2("sa_qkv_b")          # (L, 3E)
    attn = mha(qkv[:, 0:E], qkv[:, E:2 * E], qkv[:, 2 * E:3 * E],
               tmask_keep, w2("sa_o_w"), w2("sa_o_b"))
    query = x + attn                                      # dropout == identity

    # --- cross-attention: key == value == enc_out, shared LN + fused (E,2E) KV ---
    enc_n = ln(enc, w2("n1_g"), w2("n1_b"))
    qn = ln(query, w2("n1_g"), w2("n1_b"))
    kv = jnp.dot(enc_n.astype(cdt), w2("ca_kv_w"),
                 preferred_element_type=f32) + w2("ca_kv_b")            # (Ls, 2E)
    qc = jnp.dot(qn.astype(cdt), w2("ca_q_w"),
                 preferred_element_type=f32) + w2("ca_q_b")             # (L, E)
    attn2 = mha(qc, kv[:, 0:E], kv[:, E:2 * E],
                smask_keep, w2("ca_o_w"), w2("ca_o_b"))
    x2 = query + attn2                                    # dropout == identity

    # --- fused feed-forward (ff1 + ReLU + ff2) + residual ---
    fin = ln(x2, w2("n2_g"), w2("n2_b"))
    hmid = jnp.dot(fin.astype(cdt), w2("ff1_w"),
                   preferred_element_type=f32) + w2("ff1_b")
    hmid = jnp.maximum(hmid, 0.0)
    ff = jnp.dot(hmid.astype(cdt), w2("ff2_w"),
                 preferred_element_type=f32) + w2("ff2_b")
    new_x = x2 + ff                                       # dropout == identity

    act_ref[...] = new_x                                  # carry to next layer (VMEM)

    @pl.when(l == n_layers - 1)
    def _():
        o_ref[0] = new_x.astype(o_ref.dtype)              # lane-dense (L, E) slab


def decoder_stack_pallas(stacked_w, x, enc_out, src_mask, trg_mask, *,
                         heads, causal_trg_mask):
    """Runs ALL decoder layers in one pallas_call.  x: (N, L, E), enc_out: (N, Ls, E)."""
    N, L, E = x.shape
    Ls = enc_out.shape[1]
    head_dim = E // heads
    num_layers = stacked_w["dn_g"].shape[0]
    weights = [stacked_w[name] for name in _DEC_WEIGHT_NAMES]   # (num_layers, r, c)

    def wspec(arr):
        r, c = arr.shape[1], arr.shape[2]
        return pl.BlockSpec((1, r, c), lambda n, l: (l, 0, 0))  # one layer's weights

    in_specs = [
        pl.BlockSpec((1, L, E), lambda n, l: (n, 0, 0)),        # x (read at layer 0)
        pl.BlockSpec((1, Ls, E), lambda n, l: (n, 0, 0)),       # enc_out
        pl.BlockSpec((1, 1, src_mask.shape[2], src_mask.shape[3]),
                     lambda n, l: (n, 0, 0, 0)),                # src mask (small)
    ]
    inputs = [x, enc_out, src_mask]
    if not causal_trg_mask:
        in_specs.append(pl.BlockSpec((1, 1, trg_mask.shape[2], trg_mask.shape[3]),
                                     lambda n, l: (n, 0, 0, 0)))
        inputs.append(trg_mask)
    in_specs += [wspec(w) for w in weights]
    inputs += weights

    kernel = functools.partial(_decoder_stack_kernel, heads=heads,
                               head_dim=head_dim, causal=causal_trg_mask)
    return pl.pallas_call(
        kernel,
        out_shape=jax.ShapeDtypeStruct((N, L, E), x.dtype),
        grid_spec=pltpu.PrefetchScalarGridSpec(
            num_scalar_prefetch=0,
            grid=(N, num_layers),                                # layer axis innermost
            in_specs=in_specs,
            out_specs=pl.BlockSpec((1, L, E), lambda n, l: (n, 0, 0)),
            scratch_shapes=[pltpu.VMEM((L, E), jnp.float32)],    # resident activations
        ),
        compiler_params=pltpu.CompilerParams(
            dimension_semantics=("parallel", "arbitrary"),
            vmem_limit_bytes=_VMEM_LIMIT_BYTES),
    )(*inputs)


# ----------------------------------------------------------------------------
# final vocab projection kernel (row + Nout tiled, bf16 weight stream)
# ----------------------------------------------------------------------------

def _linear_kernel(x_ref, w_ref, b_ref, o_ref):
    y = jnp.dot(x_ref[...].astype(w_ref.dtype), w_ref[...],
                preferred_element_type=jnp.float32)
    o_ref[...] = (y + b_ref[...]).astype(o_ref.dtype)


def linear_pallas(x2d, w, b):
    """y = x2d @ w + b.  x2d: (M, K) f32, w: (K, Nout) bf16, b: (1, Nout) f32."""
    M, K = x2d.shape
    Kw, Nout = w.shape
    assert K == Kw
    bm = _pick_row_block(M)
    bn = _pick_col_block(Nout)
    # j (Nout) is the fastest grid axis -> the (bm, K) LHS block stays resident.
    return pl.pallas_call(
        _linear_kernel,
        out_shape=jax.ShapeDtypeStruct((M, Nout), x2d.dtype),
        grid_spec=pltpu.PrefetchScalarGridSpec(
            num_scalar_prefetch=0,
            grid=(M // bm, Nout // bn),
            in_specs=[
                pl.BlockSpec((bm, K), lambda i, j: (i, 0)),
                pl.BlockSpec((K, bn), lambda i, j: (0, j)),
                pl.BlockSpec((1, bn), lambda i, j: (0, j)),
            ],
            out_specs=pl.BlockSpec((bm, bn), lambda i, j: (i, j)),
        ),
        compiler_params=pltpu.CompilerParams(
            dimension_semantics=("parallel", "parallel"),
            vmem_limit_bytes=_VMEM_LIMIT_BYTES),
    )(x2d, w, b)


# ----------------------------------------------------------------------------
# Decoder forward (embedding gather in JAX, everything else in the kernels above)
# ----------------------------------------------------------------------------

def decoder_fwd(kparams, x_tokens, enc_out, src_mask, trg_mask, *,
                heads, causal_trg_mask=False):
    N, L = x_tokens.shape
    E = kparams["word_emb"].shape[1]
    V = kparams["fc_w"].shape[1]
    positions = jnp.arange(L)[None, :]
    # TODO(synk): embedding gather has no clean Pallas equivalent at this size; done in JAX.
    h = kparams["word_emb"][x_tokens] + kparams["pos_emb"][positions]
    h = h.astype(jnp.float32)                              # dropout == identity (eval)
    h = decoder_stack_pallas(kparams["stacked"], h, enc_out, src_mask, trg_mask,
                             heads=heads, causal_trg_mask=causal_trg_mask)
    out = linear_pallas(h.reshape(-1, E), kparams["fc_w"], kparams["fc_b"])
    return out.reshape(N, L, V)


# ----------------------------------------------------------------------------
# Parameter init (torch-equivalent, f32) + kernel-layout preparation
# ----------------------------------------------------------------------------

def _init_linear(key, fan_in, fan_out):
    k1, k2 = jax.random.split(key)
    bound = 1.0 / math.sqrt(fan_in)
    w = jax.random.uniform(k1, (fan_in, fan_out), jnp.float32, -bound, bound)
    b = jax.random.uniform(k2, (1, fan_out), jnp.float32, -bound, bound)
    return w, b


def _init_self_attention(key, E):
    kq, kk, kv, ko = jax.random.split(key, 4)
    q_w, q_b = _init_linear(kq, E, E)
    k_w, k_b = _init_linear(kk, E, E)
    v_w, v_b = _init_linear(kv, E, E)
    o_w, o_b = _init_linear(ko, E, E)
    return {"qkv_w": jnp.concatenate([q_w, k_w, v_w], axis=1),   # [Q | K | V]
            "qkv_b": jnp.concatenate([q_b, k_b, v_b], axis=1),
            "o_w": o_w, "o_b": o_b}


def _init_cross_attention(key, E):
    kq, kk, kv, ko = jax.random.split(key, 4)
    q_w, q_b = _init_linear(kq, E, E)
    k_w, k_b = _init_linear(kk, E, E)
    v_w, v_b = _init_linear(kv, E, E)
    o_w, o_b = _init_linear(ko, E, E)
    return {"q_w": q_w, "q_b": q_b,
            "kv_w": jnp.concatenate([k_w, v_w], axis=1),         # [K | V]
            "kv_b": jnp.concatenate([k_b, v_b], axis=1),
            "o_w": o_w, "o_b": o_b}


def _init_decoder_block(key, E, ff_hidden):
    k_sa, k_ca, k_ff1, k_ff2 = jax.random.split(key, 4)
    sa = _init_self_attention(k_sa, E)
    ca = _init_cross_attention(k_ca, E)
    ff1_w, ff1_b = _init_linear(k_ff1, E, ff_hidden)
    ff2_w, ff2_b = _init_linear(k_ff2, ff_hidden, E)
    ones = jnp.ones((1, E), jnp.float32)
    zeros = jnp.zeros((1, E), jnp.float32)
    return {
        "dn_g": ones, "dn_b": zeros,                       # DecoderBlock.norm
        "sa_qkv_w": sa["qkv_w"], "sa_qkv_b": sa["qkv_b"],
        "sa_o_w": sa["o_w"], "sa_o_b": sa["o_b"],
        "n1_g": ones, "n1_b": zeros,                       # TransformerBlock.norm1
        "ca_q_w": ca["q_w"], "ca_q_b": ca["q_b"],
        "ca_kv_w": ca["kv_w"], "ca_kv_b": ca["kv_b"],
        "ca_o_w": ca["o_w"], "ca_o_b": ca["o_b"],
        "n2_g": ones, "n2_b": zeros,                       # TransformerBlock.norm2
        "ff1_w": ff1_w, "ff1_b": ff1_b,
        "ff2_w": ff2_w, "ff2_b": ff2_b,
    }


def init_decoder_params(key, vocab, E, num_layers, heads, forward_expansion, max_length):
    keys = jax.random.split(key, num_layers + 3)
    params = {
        "word_emb": jax.random.normal(keys[0], (vocab, E), jnp.float32),
        "pos_emb": jax.random.normal(keys[1], (max_length, E), jnp.float32),
        "layers": [
            _init_decoder_block(keys[2 + i], E, forward_expansion * E)
            for i in range(num_layers)
        ],
    }
    fc_w, fc_b = _init_linear(keys[2 + num_layers], E, vocab)
    params["fc_w"], params["fc_b"] = fc_w, fc_b
    return params


def prepare_kernel_params(params, heads, matmul_dtype=_MATMUL_DTYPE):
    """Stack per-layer weights on a layer axis, fold the 1/sqrt(head_dim) scale into
    the Q projection (weight AND bias), and cast matmul weights to bf16."""
    E = params["word_emb"].shape[1]
    scale = 1.0 / math.sqrt(E // heads)
    stacked = {}
    for name in _DEC_WEIGHT_NAMES:
        w = jnp.stack([lp[name] for lp in params["layers"]], axis=0)
        if name in ("sa_qkv_w", "sa_qkv_b"):
            w = w.at[..., :E].multiply(scale)              # Q columns of fused QKV
        elif name in ("ca_q_w", "ca_q_b"):
            w = w * scale
        if name.endswith("_w"):
            w = w.astype(matmul_dtype)                     # MXU operand weights -> bf16
        stacked[name] = w
    return {
        "word_emb": params["word_emb"],
        "pos_emb": params["pos_emb"],
        "stacked": stacked,
        "fc_w": params["fc_w"].astype(matmul_dtype),
        "fc_b": params["fc_b"],
    }


# ----------------------------------------------------------------------------
# Pure-JAX reference (mirrors the PyTorch module op-for-op, f32 throughout)
# ----------------------------------------------------------------------------

def _ln_ref(x, g, b):
    mu = jnp.mean(x, axis=-1, keepdims=True)
    var = jnp.mean((x - mu) ** 2, axis=-1, keepdims=True)
    return (x - mu) / jnp.sqrt(var + 1e-5) * g + b


def _attention_ref(v_in, k_in, q_in, q_w, q_b, k_w, k_b, v_w, v_b, o_w, o_b,
                   mask, heads):
    N, Lq, E = q_in.shape
    Lk = k_in.shape[1]
    hd = E // heads
    q = (q_in @ q_w + q_b).reshape(N, Lq, heads, hd)
    k = (k_in @ k_w + k_b).reshape(N, Lk, heads, hd)
    v = (v_in @ v_w + v_b).reshape(N, Lk, heads, hd)
    e = jnp.einsum("nqhd,nkhd->nhqk", q, k)
    e = jnp.where(mask == 0, -1e20, e)
    a = jax.nn.softmax(e / math.sqrt(hd), axis=3)
    out = jnp.einsum("nhqk,nkhd->nqhd", a, v).reshape(N, Lq, E)
    return out @ o_w + o_b


def _decoder_block_ref(p, x, enc, src_mask, trg_mask, heads):
    E = x.shape[-1]
    xn = _ln_ref(x, p["dn_g"], p["dn_b"])
    att = _attention_ref(xn, xn, xn,
                         p["sa_qkv_w"][:, 0:E], p["sa_qkv_b"][:, 0:E],
                         p["sa_qkv_w"][:, E:2 * E], p["sa_qkv_b"][:, E:2 * E],
                         p["sa_qkv_w"][:, 2 * E:3 * E], p["sa_qkv_b"][:, 2 * E:3 * E],
                         p["sa_o_w"], p["sa_o_b"], trg_mask, heads)
    query = x + att
    vn = _ln_ref(enc, p["n1_g"], p["n1_b"])
    qn = _ln_ref(query, p["n1_g"], p["n1_b"])
    att2 = _attention_ref(vn, vn, qn,
                          p["ca_q_w"], p["ca_q_b"],
                          p["ca_kv_w"][:, 0:E], p["ca_kv_b"][:, 0:E],
                          p["ca_kv_w"][:, E:2 * E], p["ca_kv_b"][:, E:2 * E],
                          p["ca_o_w"], p["ca_o_b"], src_mask, heads)
    x2 = query + att2
    fin = _ln_ref(x2, p["n2_g"], p["n2_b"])
    ff = jnp.maximum(fin @ p["ff1_w"] + p["ff1_b"], 0.0) @ p["ff2_w"] + p["ff2_b"]
    return x2 + ff


def decoder_fwd_ref(params, x_tokens, enc_out, src_mask, trg_mask, *, heads):
    N, L = x_tokens.shape
    pos = jnp.arange(L)[None, :]
    h = params["word_emb"][x_tokens] + params["pos_emb"][pos]
    for lp in params["layers"]:
        h = _decoder_block_ref(lp, h, enc_out, src_mask, trg_mask, heads)
    return h @ params["fc_w"] + params["fc_b"]


# ----------------------------------------------------------------------------
# Main
# ----------------------------------------------------------------------------

if __name__ == "__main__":
    N, L_trg, L_src = 2, 8, 8
    E, heads, forward_expansion, num_layers = 32, 4, 2, 2
    vocab, max_length = 50, 16

    root = jax.random.PRNGKey(0)
    k_params, k_tok, k_enc = jax.random.split(root, 3)

    params = init_decoder_params(k_params, vocab, E, num_layers, heads,
                                 forward_expansion, max_length)
    kparams = prepare_kernel_params(params, heads)

    x_tokens = jax.random.randint(k_tok, (N, L_trg), 0, vocab, dtype=jnp.int32)
    enc_out = jax.random.normal(k_enc, (N, L_src, E), jnp.float32)

    # masks: trg causal (N,1,L_trg,L_trg), src all-ones (N,1,1,L_src)
    trg_mask = jnp.broadcast_to(
        jnp.tril(jnp.ones((L_trg, L_trg), jnp.float32))[None, None],
        (N, 1, L_trg, L_trg))
    src_mask = jnp.ones((N, 1, 1, L_src), jnp.float32)

    fwd_causal = jax.jit(functools.partial(decoder_fwd, heads=heads,
                                           causal_trg_mask=True))
    fwd_masked = jax.jit(functools.partial(decoder_fwd, heads=heads,
                                           causal_trg_mask=False))

    out = jax.block_until_ready(fwd_causal(kparams, x_tokens, enc_out,
                                           src_mask, trg_mask))
    out2 = jax.block_until_ready(fwd_masked(kparams, x_tokens, enc_out,
                                            src_mask, trg_mask))
    ref = decoder_fwd_ref(params, x_tokens, enc_out, src_mask, trg_mask, heads=heads)

    assert out.shape == (N, L_trg, vocab), out.shape
    assert bool(jnp.all(jnp.isfinite(out)))
    # in-kernel causal mask path == explicit trg_mask path (identical arithmetic)
    assert bool(jnp.allclose(out, out2, atol=1e-4, rtol=1e-4))
    # bf16-MXU kernel vs pure-f32 JAX reference (loose tolerance for bf16 operands)
    assert float(jnp.max(jnp.abs(out - ref))) < 0.25
    print("KERNEL_OK")
</pallas_src>

<mosaic_0001>
module attributes {stable_mosaic.version = 11 : i64} {
  func.func @_linear_kernel(%arg0: i32, %arg1: i32, %arg2: memref<16x32xf32, #tpu.memory_space<vmem>>, %arg3: memref<32x50xbf16, #tpu.memory_space<vmem>>, %arg4: memref<1x50xf32, #tpu.memory_space<vmem>>, %arg5: memref<16x50xf32, #tpu.memory_space<vmem>>) attributes {dimension_semantics = [#tpu.dimension_semantics<parallel>, #tpu.dimension_semantics<parallel>], iteration_bounds = array<i64: 1, 1>, scalar_prefetch = 0 : i64, scratch_operands = 0 : i64, tpu.core_type = #tpu.core_type<tc>, window_params = [{transform_indices = @transform_0, window_bounds = array<i64: 16, 32>}, {transform_indices = @transform_1, window_bounds = array<i64: 32, 50>}, {transform_indices = @transform_2, window_bounds = array<i64: 1, 50>}, {transform_indices = @transform_3, window_bounds = array<i64: 16, 50>}]} {
    %c0 = arith.constant 0 : index
    %c0_0 = arith.constant 0 : index
    %0 = vector.load %arg2[%c0, %c0_0] : memref<16x32xf32, #tpu.memory_space<vmem>>, vector<16x32xf32>
    %1 = arith.truncf %0 : vector<16x32xf32> to vector<16x32xbf16>
    %c0_1 = arith.constant 0 : index
    %c0_2 = arith.constant 0 : index
    %2 = vector.load %arg3[%c0_1, %c0_2] : memref<32x50xbf16, #tpu.memory_space<vmem>>, vector<32x50xbf16>
    %cst = arith.constant dense<0.000000e+00> : vector<16x50xf32>
    %3 = tpu.matmul %1, %2, %cst {dimension_numbers = #tpu.dot_dimension_numbers<[1], [0], [0], [1], [0, 0, 1, 1], [], []>} : vector<16x32xbf16>, vector<32x50xbf16>, vector<16x50xf32> -> vector<16x50xf32>
    %c0_3 = arith.constant 0 : index
    %c0_4 = arith.constant 0 : index
    %4 = vector.load %arg4[%c0_3, %c0_4] : memref<1x50xf32, #tpu.memory_space<vmem>>, vector<1x50xf32>
    %5 = vector.broadcast %4 : vector<1x50xf32> to vector<16x50xf32>
    %6 = arith.addf %3, %5 : vector<16x50xf32>
    %c0_5 = arith.constant 0 : index
    %c0_6 = arith.constant 0 : index
    %7 = vector.load %arg5[%c0_5, %c0_6] : memref<16x50xf32, #tpu.memory_space<vmem>>, vector<16x50xf32>
    tpu.vector_store %arg5[%c0_5, %c0_6], %6 {strides = array<i32>} : memref<16x50xf32, #tpu.memory_space<vmem>>, vector<16x50xf32>,
    return
  }
  func.func @transform_0(%arg0: i32, %arg1: i32) -> (i32, i32) {
    %c0_i32 = arith.constant 0 : i32
    %c0_i32_0 = arith.constant 0 : i32
    return %arg0, %c0_i32 : i32, i32
  }
  func.func @transform_1(%arg0: i32, %arg1: i32) -> (i32, i32) {
    %c0_i32 = arith.constant 0 : i32
    %c0_i32_0 = arith.constant 0 : i32
    return %c0_i32, %arg1 : i32, i32
  }
  func.func @transform_2(%arg0: i32, %arg1: i32) -> (i32, i32) {
    %c0_i32 = arith.constant 0 : i32
    %c0_i32_0 = arith.constant 0 : i32
    return %c0_i32, %arg1 : i32, i32
  }
  func.func @transform_3(%arg0: i32, %arg1: i32) -> (i32, i32) {
    %c0_i32 = arith.constant 0 : i32
    return %arg0, %arg1 : i32, i32
  }
}

module attributes {stable_mosaic.version = 11 : i64} {
  func.func @_decoder_stack_kernel(%arg0: i32, %arg1: i32, %arg2: memref<1x8x32xf32, #tpu.memory_space<vmem>>, %arg3: memref<1x8x32xf32, #tpu.memory_space<vmem>>, %arg4: memref<1x1x1x8xf32, #tpu.memory_space<vmem>>, %arg5: memref<1x1x32xf32, #tpu.memory_space<vmem>>, %arg6: memref<1x1x32xf32, #tpu.memory_space<vmem>>, %arg7: memref<1x32x96xbf16, #tpu.memory_space<vmem>>, %arg8: memref<1x1x96xf32, #tpu.memory_space<vmem>>, %arg9: memref<1x32x32xbf16, #tpu.memory_space<vmem>>, %arg10: memref<1x1x32xf32, #tpu.memory_space<vmem>>, %arg11: memref<1x1x32xf32, #tpu.memory_space<vmem>>, %arg12: memref<1x1x32xf32, #tpu.memory_space<vmem>>, %arg13: memref<1x32x32xbf16, #tpu.memory_space<vmem>>, %arg14: memref<1x1x32xf32, #tpu.memory_space<vmem>>, %arg15: memref<1x32x64xbf16, #tpu.memory_space<vmem>>, %arg16: memref<1x1x64xf32, #tpu.memory_space<vmem>>, %arg17: memref<1x32x32xbf16, #tpu.memory_space<vmem>>, %arg18: memref<1x1x32xf32, #tpu.memory_space<vmem>>, %arg19: memref<1x1x32xf32, #tpu.memory_space<vmem>>, %arg20: memref<1x1x32xf32, #tpu.memory_space<vmem>>, %arg21: memref<1x32x64xbf16, #tpu.memory_space<vmem>>, %arg22: memref<1x1x64xf32, #tpu.memory_space<vmem>>, %arg23: memref<1x64x32xbf16, #tpu.memory_space<vmem>>, %arg24: memref<1x1x32xf32, #tpu.memory_space<vmem>>, %arg25: memref<1x8x32xf32, #tpu.memory_space<vmem>>, %arg26: memref<8x32xf32, #tpu.memory_space<vmem>>) attributes {dimension_semantics = [#tpu.dimension_semantics<parallel>, #tpu.dimension_semantics<arbitrary>], iteration_bounds = array<i64: 2, 2>, scalar_prefetch = 0 : i64, scratch_operands = 1 : i64, tpu.core_type = #tpu.core_type<tc>, window_params = [{transform_indices = @transform_0, window_bounds = array<i64: 1, 8, 32>}, {transform_indices = @transform_1, window_bounds = array<i64: 1, 8, 32>}, {transform_indices = @transform_2, window_bounds = array<i64: 1, 1, 1, 8>}, {transform_indices = @transform_3, window_bounds = array<i64: 1, 1, 32>}, {transform_indices = @transform_4, window_bounds = array<i64: 1, 1, 32>}, {transform_indices = @transform_5, window_bounds = array<i64: 1, 32, 96>}, {transform_indices = @transform_6, window_bounds = array<i64: 1, 1, 96>}, {transform_indices = @transform_7, window_bounds = array<i64: 1, 32, 32>}, {transform_indices = @transform_8, window_bounds = array<i64: 1, 1, 32>}, {transform_indices = @transform_9, window_bounds = array<i64: 1, 1, 32>}, {transform_indices = @transform_10, window_bounds = array<i64: 1, 1, 32>}, {transform_indices = @transform_11, window_bounds = array<i64: 1, 32, 32>}, {transform_indices = @transform_12, window_bounds = array<i64: 1, 1, 32>}, {transform_indices = @transform_13, window_bounds = array<i64: 1, 32, 64>}, {transform_indices = @transform_14, window_bounds = array<i64: 1, 1, 64>}, {transform_indices = @transform_15, window_bounds = array<i64: 1, 32, 32>}, {transform_indices = @transform_16, window_bounds = array<i64: 1, 1, 32>}, {transform_indices = @transform_17, window_bounds = array<i64: 1, 1, 32>}, {transform_indices = @transform_18, window_bounds = array<i64: 1, 1, 32>}, {transform_indices = @transform_19, window_bounds = array<i64: 1, 32, 64>}, {transform_indices = @transform_20, window_bounds = array<i64: 1, 1, 64>}, {transform_indices = @transform_21, window_bounds = array<i64: 1, 64, 32>}, {transform_indices = @transform_22, window_bounds = array<i64: 1, 1, 32>}, {transform_indices = @transform_23, window_bounds = array<i64: 1, 8, 32>}]} {
    %c0_i32 = arith.constant 0 : i32
    %0 = arith.cmpi eq, %arg1, %c0_i32 : i32
    %1 = arith.extui %0 : i1 to i32
    %c0_i32_0 = arith.constant 0 : i32
    %2 = arith.cmpi ne, %1, %c0_i32_0 : i32
    scf.if %2 {
      %c0_146 = arith.constant 0 : index
      %c0_147 = arith.constant 0 : index
      %c0_148 = arith.constant 0 : index
      %349 = vector.load %arg2[%c0_146, %c0_147, %c0_148] : memref<1x8x32xf32, #tpu.memory_space<vmem>>, vector<1x8x32xf32>
      %350 = vector.shape_cast %349 : vector<1x8x32xf32> to vector<8x32xf32>
      %c0_149 = arith.constant 0 : index
      %c0_150 = arith.constant 0 : index
      %351 = vector.load %arg26[%c0_149, %c0_150] : memref<8x32xf32, #tpu.memory_space<vmem>>, vector<8x32xf32>
      tpu.vector_store %arg26[%c0_149, %c0_150], %350 {strides = array<i32>} : memref<8x32xf32, #tpu.memory_space<vmem>>, vector<8x32xf32>,
    } else {
    }
    %c0 = arith.constant 0 : index
    %c0_1 = arith.constant 0 : index
    %3 = vector.load %arg26[%c0, %c0_1] : memref<8x32xf32, #tpu.memory_space<vmem>>, vector<8x32xf32>
    %c0_2 = arith.constant 0 : index
    %c0_3 = arith.constant 0 : index
    %c0_4 = arith.constant 0 : index
    %4 = vector.load %arg3[%c0_2, %c0_3, %c0_4] : memref<1x8x32xf32, #tpu.memory_space<vmem>>, vector<1x8x32xf32>
    %5 = vector.shape_cast %4 : vector<1x8x32xf32> to vector<8x32xf32>
    %c0_5 = arith.constant 0 : index
    %c0_6 = arith.constant 0 : index
    %c0_7 = arith.constant 0 : index
    %c0_8 = arith.constant 0 : index
    %6 = vector.load %arg4[%c0_5, %c0_6, %c0_7, %c0_8] : memref<1x1x1x8xf32, #tpu.memory_space<vmem>>, vector<1x1x1x8xf32>
    %7 = vector.shape_cast %6 : vector<1x1x1x8xf32> to vector<1x8xf32>
    %cst = arith.constant 0.000000e+00 : f32
    %8 = vector.broadcast %cst : f32 to vector<1x8xf32>
    %9 = arith.cmpf one, %7, %8 : vector<1x8xf32>
    %10 = tpu.iota {dimensions = array<i32: 0>} : vector<8x8xi32>
    %11 = tpu.iota {dimensions = array<i32: 1>} : vector<8x8xi32>
    %12 = arith.cmpi sge, %10, %11 : vector<8x8xi32>
    %c0_9 = arith.constant 0 : index
    %c0_10 = arith.constant 0 : index
    %c0_11 = arith.constant 0 : index
    %13 = vector.load %arg5[%c0_9, %c0_10, %c0_11] : memref<1x1x32xf32, #tpu.memory_space<vmem>>, vector<1x1x32xf32>
    %14 = vector.shape_cast %13 : vector<1x1x32xf32> to vector<1x32xf32>
    %c0_12 = arith.constant 0 : index
    %c0_13 = arith.constant 0 : index
    %c0_14 = arith.constant 0 : index
    %15 = vector.load %arg6[%c0_12, %c0_13, %c0_14] : memref<1x1x32xf32, #tpu.memory_space<vmem>>, vector<1x1x32xf32>
    %16 = vector.shape_cast %15 : vector<1x1x32xf32> to vector<1x32xf32>
    %cst_15 = arith.constant dense<0.000000e+00> : vector<8xf32>
    %17 = vector.multi_reduction <add>, %3, %cst_15 [1] : vector<8x32xf32> to vector<8xf32>
    %18 = vector.shape_cast %17 : vector<8xf32> to vector<8x1xf32>
    %cst_16 = arith.constant 3.200000e+01 : f32
    %19 = vector.broadcast %cst_16 : f32 to vector<8x1xf32>
    %20 = arith.divf %18, %19 : vector<8x1xf32>
    %21 = vector.broadcast %20 : vector<8x1xf32> to vector<8x32xf32>
    %22 = arith.subf %3, %21 : vector<8x32xf32>
    %23 = arith.mulf %22, %22 : vector<8x32xf32>
    %cst_17 = arith.constant dense<0.000000e+00> : vector<8xf32>
    %24 = vector.multi_reduction <add>, %23, %cst_17 [1] : vector<8x32xf32> to vector<8xf32>
    %25 = vector.shape_cast %24 : vector<8xf32> to vector<8x1xf32>
    %cst_18 = arith.constant 3.200000e+01 : f32
    %26 = vector.broadcast %cst_18 : f32 to vector<8x1xf32>
    %27 = arith.divf %25, %26 : vector<8x1xf32>
    %cst_19 = arith.constant 9.99999974E-6 : f32
    %28 = vector.broadcast %cst_19 : f32 to vector<8x1xf32>
    %29 = arith.addf %27, %28 : vector<8x1xf32>
    %30 = math.rsqrt %29 : vector<8x1xf32>
    %31 = vector.broadcast %30 : vector<8x1xf32> to vector<8x32xf32>
    %32 = arith.mulf %22, %31 : vector<8x32xf32>
    %33 = vector.broadcast %14 : vector<1x32xf32> to vector<8x32xf32>
    %34 = arith.mulf %32, %33 : vector<8x32xf32>
    %35 = vector.broadcast %16 : vector<1x32xf32> to vector<8x32xf32>
    %36 = arith.addf %34, %35 : vector<8x32xf32>
    %37 = arith.truncf %36 : vector<8x32xf32> to vector<8x32xbf16>
    %c0_20 = arith.constant 0 : index
    %c0_21 = arith.constant 0 : index
    %c0_22 = arith.constant 0 : index
    %38 = vector.load %arg7[%c0_20, %c0_21, %c0_22] : memref<1x32x96xbf16, #tpu.memory_space<vmem>>, vector<1x32x96xbf16>
    %39 = vector.shape_cast %38 : vector<1x32x96xbf16> to vector<32x96xbf16>
    %cst_23 = arith.constant dense<0.000000e+00> : vector<8x96xf32>
    %40 = tpu.matmul %37, %39, %cst_23 {dimension_numbers = #tpu.dot_dimension_numbers<[1], [0], [0], [1], [0, 0, 1, 1], [], []>} : vector<8x32xbf16>, vector<32x96xbf16>, vector<8x96xf32> -> vector<8x96xf32>
    %c0_24 = arith.constant 0 : index
    %c0_25 = arith.constant 0 : index
    %c0_26 = arith.constant 0 : index
    %41 = vector.load %arg8[%c0_24, %c0_25, %c0_26] : memref<1x1x96xf32, #tpu.memory_space<vmem>>, vector<1x1x96xf32>
    %42 = vector.shape_cast %41 : vector<1x1x96xf32> to vector<1x96xf32>
    %43 = vector.broadcast %42 : vector<1x96xf32> to vector<8x96xf32>
    %44 = arith.addf %40, %43 : vector<8x96xf32>
    %45 = vector.extract_strided_slice %44 {offsets = [0, 0], sizes = [8, 32], strides = [1, 1]} : vector<8x96xf32> to vector<8x32xf32>
    %46 = vector.extract_strided_slice %44 {offsets = [0, 32], sizes = [8, 32], strides = [1, 1]} : vector<8x96xf32> to vector<8x32xf32>
    %47 = vector.extract_strided_slice %44 {offsets = [0, 64], sizes = [8, 32], strides = [1, 1]} : vector<8x96xf32> to vector<8x32xf32>
    %c0_27 = arith.constant 0 : index
    %c0_28 = arith.constant 0 : index
    %c0_29 = arith.constant 0 : index
    %48 = vector.load %arg9[%c0_27, %c0_28, %c0_29] : memref<1x32x32xbf16, #tpu.memory_space<vmem>>, vector<1x32x32xbf16>
    %49 = vector.shape_cast %48 : vector<1x32x32xbf16> to vector<32x32xbf16>
    %c0_30 = arith.constant 0 : index
    %c0_31 = arith.constant 0 : index
    %c0_32 = arith.constant 0 : index
    %50 = vector.load %arg10[%c0_30, %c0_31, %c0_32] : memref<1x1x32xf32, #tpu.memory_space<vmem>>, vector<1x1x32xf32>
    %51 = vector.shape_cast %50 : vector<1x1x32xf32> to vector<1x32xf32>
    %52 = vector.extract_strided_slice %45 {offsets = [0, 0], sizes = [8, 8], strides = [1, 1]} : vector<8x32xf32> to vector<8x8xf32>
    %53 = arith.truncf %52 : vector<8x8xf32> to vector<8x8xbf16>
    %54 = vector.extract_strided_slice %46 {offsets = [0, 0], sizes = [8, 8], strides = [1, 1]} : vector<8x32xf32> to vector<8x8xf32>
    %55 = arith.truncf %54 : vector<8x8xf32> to vector<8x8xbf16>
    %56 = vector.extract_strided_slice %47 {offsets = [0, 0], sizes = [8, 8], strides = [1, 1]} : vector<8x32xf32> to vector<8x8xf32>
    %57 = arith.truncf %56 : vector<8x8xf32> to vector<8x8xbf16>
    %cst_33 = arith.constant dense<0.000000e+00> : vector<8x8xf32>
    %58 = tpu.matmul %53, %55, %cst_33 {dimension_numbers = #tpu.dot_dimension_numbers<[1], [1], [0], [0], [0, 0, 1, 0], [], []>} : vector<8x8xbf16>, vector<8x8xbf16>, vector<8x8xf32> -> vector<8x8xf32>
    %cst_34 = arith.constant -1.000000e+20 : f32
    %59 = vector.broadcast %cst_34 : f32 to vector<8x8xf32>
    %60 = arith.select %12, %58, %59 : vector<8x8xi1>, vector<8x8xf32>
    %cst_35 = arith.constant dense<0xFF800000> : vector<8xf32>
    %61 = vector.multi_reduction <maximumf>, %60, %cst_35 [1] : vector<8x8xf32> to vector<8xf32>
    %62 = vector.shape_cast %61 : vector<8xf32> to vector<8x1xf32>
    %63 = vector.broadcast %62 : vector<8x1xf32> to vector<8x8xf32>
    %64 = arith.subf %60, %63 : vector<8x8xf32>
    %65 = math.exp %64 : vector<8x8xf32>
    %cst_36 = arith.constant dense<0.000000e+00> : vector<8xf32>
    %66 = vector.multi_reduction <add>, %65, %cst_36 [1] : vector<8x8xf32> to vector<8xf32>
    %67 = vector.shape_cast %66 : vector<8xf32> to vector<8x1xf32>
    %68 = vector.broadcast %67 : vector<8x1xf32> to vector<8x8xf32>
    %69 = arith.divf %65, %68 : vector<8x8xf32>
    %70 = arith.truncf %69 : vector<8x8xf32> to vector<8x8xbf16>
    %cst_37 = arith.constant dense<0.000000e+00> : vector<8x8xf32>
    %71 = tpu.matmul %70, %57, %cst_37 {dimension_numbers = #tpu.dot_dimension_numbers<[1], [0], [0], [1], [0, 0, 1, 1], [], []>} : vector<8x8xbf16>, vector<8x8xbf16>, vector<8x8xf32> -> vector<8x8xf32>
    %72 = vector.extract_strided_slice %45 {offsets = [0, 8], sizes = [8, 8], strides = [1, 1]} : vector<8x32xf32> to vector<8x8xf32>
    %73 = arith.truncf %72 : vector<8x8xf32> to vector<8x8xbf16>
    %74 = vector.extract_strided_slice %46 {offsets = [0, 8], sizes = [8, 8], strides = [1, 1]} : vector<8x32xf32> to vector<8x8xf32>
    %75 = arith.truncf %74 : vector<8x8xf32> to vector<8x8xbf16>
    %76 = vector.extract_strided_slice %47 {offsets = [0, 8], sizes = [8, 8], strides = [1, 1]} : vector<8x32xf32> to vector<8x8xf32>
    %77 = arith.truncf %76 : vector<8x8xf32> to vector<8x8xbf16>
    %cst_38 = arith.constant dense<0.000000e+00> : vector<8x8xf32>
    %78 = tpu.matmul %73, %75, %cst_38 {dimension_numbers = #tpu.dot_dimension_numbers<[1], [1], [0], [0], [0, 0, 1, 0], [], []>} : vector<8x8xbf16>, vector<8x8xbf16>, vector<8x8xf32> -> vector<8x8xf32>
    %cst_39 = arith.constant -1.000000e+20 : f32
    %79 = vector.broadcast %cst_39 : f32 to vector<8x8xf32>
    %80 = arith.select %12, %78, %79 : vector<8x8xi1>, vector<8x8xf32>
    %cst_40 = arith.constant dense<0xFF800000> : vector<8xf32>
    %81 = vector.multi_reduction <maximumf>, %80, %cst_40 [1] : vector<8x8xf32> to vector<8xf32>
    %82 = vector.shape_cast %81 : vector<8xf32> to vector<8x1xf32>
    %83 = vector.broadcast %82 : vector<8x1xf32> to vector<8x8xf32>
    %84 = arith.subf %80, %83 : vector<8x8xf32>
    %85 = math.exp %84 : vector<8x8xf32>
    %cst_41 = arith.constant dense<0.000000e+00> : vector<8xf32>
    %86 = vector.multi_reduction <add>, %85, %cst_41 [1] : vector<8x8xf32> to vector<8xf32>
    %87 = vector.shape_cast %86 : vector<8xf32> to vector<8x1xf32>
    %88 = vector.broadcast %87 : vector<8x1xf32> to vector<8x8xf32>
    %89 = arith.divf %85, %88 : vector<8x8xf32>
    %90 = arith.truncf %89 : vector<8x8xf32> to vector<8x8xbf16>
    %cst_42 = arith.constant dense<0.000000e+00> : vector<8x8xf32>
    %91 = tpu.matmul %90, %77, %cst_42 {dimension_numbers = #tpu.dot_dimension_numbers<[1], [0], [0], [1], [0, 0, 1, 1], [], []>} : vector<8x8xbf16>, vector<8x8xbf16>, vector<8x8xf32> -> vector<8x8xf32>
    %92 = vector.extract_strided_slice %45 {offsets = [0, 16], sizes = [8, 8], strides = [1, 1]} : vector<8x32xf32> to vector<8x8xf32>
    %93 = arith.truncf %92 : vector<8x8xf32> to vector<8x8xbf16>
    %94 = vector.extract_strided_slice %46 {offsets = [0, 16], sizes = [8, 8], strides = [1, 1]} : vector<8x32xf32> to vector<8x8xf32>
    %95 = arith.truncf %94 : vector<8x8xf32> to vector<8x8xbf16>
    %96 = vector.extract_strided_slice %47 {offsets = [0, 16], sizes = [8, 8], strides = [1, 1]} : vector<8x32xf32> to vector<8x8xf32>
    %97 = arith.truncf %96 : vector<8x8xf32> to vector<8x8xbf16>
    %cst_43 = arith.constant dense<0.000000e+00> : vector<8x8xf32>
    %98 = tpu.matmul %93, %95, %cst_43 {dimension_numbers = #tpu.dot_dimension_numbers<[1], [1], [0], [0], [0, 0, 1, 0], [], []>} : vector<8x8xbf16>, vector<8x8xbf16>, vector<8x8xf32> -> vector<8x8xf32>
    %cst_44 = arith.constant -1.000000e+20 : f32
    %99 = vector.broadcast %cst_44 : f32 to vector<8x8xf32>
    %100 = arith.select %12, %98, %99 : vector<8x8xi1>, vector<8x8xf32>
    %cst_45 = arith.constant dense<0xFF800000> : vector<8xf32>
    %101 = vector.multi_reduction <maximumf>, %100, %cst_45 [1] : vector<8x8xf32> to vector<8xf32>
    %102 = vector.shape_cast %101 : vector<8xf32> to vector<8x1xf32>
    %103 = vector.broadcast %102 : vector<8x1xf32> to vector<8x8xf32>
    %104 = arith.subf %100, %103 : vector<8x8xf32>
    %105 = math.exp %104 : vector<8x8xf32>
    %cst_46 = arith.constant dense<0.000000e+00> : vector<8xf32>
    %106 = vector.multi_reduction <add>, %105, %cst_46 [1] : vector<8x8xf32> to vector<8xf32>
    %107 = vector.shape_cast %106 : vector<8xf32> to vector<8x1xf32>
    %108 = vector.broadcast %107 : vector<8x1xf32> to vector<8x8xf32>
    %109 = arith.divf %105, %108 : vector<8x8xf32>
    %110 = arith.truncf %109 : vector<8x8xf32> to vector<8x8xbf16>
    %cst_47 = arith.constant dense<0.000000e+00> : vector<8x8xf32>
    %111 = tpu.matmul %110, %97, %cst_47 {dimension_numbers = #tpu.dot_dimension_numbers<[1], [0], [0], [1], [0, 0, 1, 1], [], []>} : vector<8x8xbf16>, vector<8x8xbf16>, vector<8x8xf32> -> vector<8x8xf32>
    %112 = vector.extract_strided_slice %45 {offsets = [0, 24], sizes = [8, 8], strides = [1, 1]} : vector<8x32xf32> to vector<8x8xf32>
    %113 = arith.truncf %112 : vector<8x8xf32> to vector<8x8xbf16>
    %114 = vector.extract_strided_slice %46 {offsets = [0, 24], sizes = [8, 8], strides = [1, 1]} : vector<8x32xf32> to vector<8x8xf32>
    %115 = arith.truncf %114 : vector<8x8xf32> to vector<8x8xbf16>
    %116 = vector.extract_strided_slice %47 {offsets = [0, 24], sizes = [8, 8], strides = [1, 1]} : vector<8x32xf32> to vector<8x8xf32>
    %117 = arith.truncf %116 : vector<8x8xf32> to vector<8x8xbf16>
    %cst_48 = arith.constant dense<0.000000e+00> : vector<8x8xf32>
    %118 = tpu.matmul %113, %115, %cst_48 {dimension_numbers = #tpu.dot_dimension_numbers<[1], [1], [0], [0], [0, 0, 1, 0], [], []>} : vector<8x8xbf16>, vector<8x8xbf16>, vector<8x8xf32> -> vector<8x8xf32>
    %cst_49 = arith.constant -1.000000e+20 : f32
    %119 = vector.broadcast %cst_49 : f32 to vector<8x8xf32>
    %120 = arith.select %12, %118, %119 : vector<8x8xi1>, vector<8x8xf32>
    %cst_50 = arith.constant dense<0xFF800000> : vector<8xf32>
    %121 = vector.multi_reduction <maximumf>, %120, %cst_50 [1] : vector<8x8xf32> to vector<8xf32>
    %122 = vector.shape_cast %121 : vector<8xf32> to vector<8x1xf32>
    %123 = vector.broadcast %122 : vector<8x1xf32> to vector<8x8xf32>
    %124 = arith.subf %120, %123 : vector<8x8xf32>
    %125 = math.exp %124 : vector<8x8xf32>
    %cst_51 = arith.constant dense<0.000000e+00> : vector<8xf32>
    %126 = vector.multi_reduction <add>, %125, %cst_51 [1] : vector<8x8xf32> to vector<8xf32>
    %127 = vector.shape_cast %126 : vector<8xf32> to vector<8x1xf32>
    %128 = vector.broadcast %127 : vector<8x1xf32> to vector<8x8xf32>
    %129 = arith.divf %125, %128 : vector<8x8xf32>
    %130 = arith.truncf %129 : vector<8x8xf32> to vector<8x8xbf16>
    %cst_52 = arith.constant dense<0.000000e+00> : vector<8x8xf32>
    %131 = tpu.matmul %130, %117, %cst_52 {dimension_numbers = #tpu.dot_dimension_numbers<[1], [0], [0], [1], [0, 0, 1, 1], [], []>} : vector<8x8xbf16>, vector<8x8xbf16>, vector<8x8xf32> -> vector<8x8xf32>
    %132 = tpu.concatenate %71, %91, %111, %131 in 1 : vector<8x8xf32>, vector<8x8xf32>, vector<8x8xf32>, vector<8x8xf32> -> vector<8x32xf32>
    %133 = arith.truncf %132 : vector<8x32xf32> to vector<8x32xbf16>
    %cst_53 = arith.constant dense<0.000000e+00> : vector<8x32xf32>
    %134 = tpu.matmul %133, %49, %cst_53 {dimension_numbers = #tpu.dot_dimension_numbers<[1], [0], [0], [1], [0, 0, 1, 1], [], []>} : vector<8x32xbf16>, vector<32x32xbf16>, vector<8x32xf32> -> vector<8x32xf32>
    %135 = vector.broadcast %51 : vector<1x32xf32> to vector<8x32xf32>
    %136 = arith.addf %134, %135 : vector<8x32xf32>
    %137 = arith.addf %3, %136 : vector<8x32xf32>
    %c0_54 = arith.constant 0 : index
    %c0_55 = arith.constant 0 : index
    %c0_56 = arith.constant 0 : index
    %138 = vector.load %arg11[%c0_54, %c0_55, %c0_56] : memref<1x1x32xf32, #tpu.memory_space<vmem>>, vector<1x1x32xf32>
    %139 = vector.shape_cast %138 : vector<1x1x32xf32> to vector<1x32xf32>
    %c0_57 = arith.constant 0 : index
    %c0_58 = arith.constant 0 : index
    %c0_59 = arith.constant 0 : index
    %140 = vector.load %arg12[%c0_57, %c0_58, %c0_59] : memref<1x1x32xf32, #tpu.memory_space<vmem>>, vector<1x1x32xf32>
    %141 = vector.shape_cast %140 : vector<1x1x32xf32> to vector<1x32xf32>
    %cst_60 = arith.constant dense<0.000000e+00> : vector<8xf32>
    %142 = vector.multi_reduction <add>, %5, %cst_60 [1] : vector<8x32xf32> to vector<8xf32>
    %143 = vector.shape_cast %142 : vector<8xf32> to vector<8x1xf32>
    %cst_61 = arith.constant 3.200000e+01 : f32
    %144 = vector.broadcast %cst_61 : f32 to vector<8x1xf32>
    %145 = arith.divf %143, %144 : vector<8x1xf32>
    %146 = vector.broadcast %145 : vector<8x1xf32> to vector<8x32xf32>
    %147 = arith.subf %5, %146 : vector<8x32xf32>
    %148 = arith.mulf %147, %147 : vector<8x32xf32>
    %cst_62 = arith.constant dense<0.000000e+00> : vector<8xf32>
    %149 = vector.multi_reduction <add>, %148, %cst_62 [1] : vector<8x32xf32> to vector<8xf32>
    %150 = vector.shape_cast %149 : vector<8xf32> to vector<8x1xf32>
    %cst_63 = arith.constant 3.200000e+01 : f32
    %151 = vector.broadcast %cst_63 : f32 to vector<8x1xf32>
    %152 = arith.divf %150, %151 : vector<8x1xf32>
    %cst_64 = arith.constant 9.99999974E-6 : f32
    %153 = vector.broadcast %cst_64 : f32 to vector<8x1xf32>
    %154 = arith.addf %152, %153 : vector<8x1xf32>
    %155 = math.rsqrt %154 : vector<8x1xf32>
    %156 = vector.broadcast %155 : vector<8x1xf32> to vector<8x32xf32>
    %157 = arith.mulf %147, %156 : vector<8x32xf32>
    %158 = vector.broadcast %139 : vector<1x32xf32> to vector<8x32xf32>
    %159 = arith.mulf %157, %158 : vector<8x32xf32>
    %160 = vector.broadcast %141 : vector<1x32xf32> to vector<8x32xf32>
    %161 = arith.addf %159, %160 : vector<8x32xf32>
    %c0_65 = arith.constant 0 : index
    %c0_66 = arith.constant 0 : index
    %c0_67 = arith.constant 0 : index
    %162 = vector.load %arg11[%c0_65, %c0_66, %c0_67] : memref<1x1x32xf32, #tpu.memory_space<vmem>>, vector<1x1x32xf32>
    %163 = vector.shape_cast %162 : vector<1x1x32xf32> to vector<1x32xf32>
    %c0_68 = arith.constant 0 : index
    %c0_69 = arith.constant 0 : index
    %c0_70 = arith.constant 0 : index
    %164 = vector.load %arg12[%c0_68, %c0_69, %c0_70] : memref<1x1x32xf32, #tpu.memory_space<vmem>>, vector<1x1x32xf32>
    %165 = vector.shape_cast %164 : vector<1x1x32xf32> to vector<1x32xf32>
    %cst_71 = arith.constant dense<0.000000e+00> : vector<8xf32>
    %166 = vector.multi_reduction <add>, %137, %cst_71 [1] : vector<8x32xf32> to vector<8xf32>
    %167 = vector.shape_cast %166 : vector<8xf32> to vector<8x1xf32>
    %cst_72 = arith.constant 3.200000e+01 : f32
    %168 = vector.broadcast %cst_72 : f32 to vector<8x1xf32>
    %169 = arith.divf %167, %168 : vector<8x1xf32>
    %170 = vector.broadcast %169 : vector<8x1xf32> to vector<8x32xf32>
    %171 = arith.subf %137, %170 : vector<8x32xf32>
    %172 = arith.mulf %171, %171 : vector<8x32xf32>
    %cst_73 = arith.constant dense<0.000000e+00> : vector<8xf32>
    %173 = vector.multi_reduction <add>, %172, %cst_73 [1] : vector<8x32xf32> to vector<8xf32>
    %174 = vector.shape_cast %173 : vector<8xf32> to vector<8x1xf32>
    %cst_74 = arith.constant 3.200000e+01 : f32
    %175 = vector.broadcast %cst_74 : f32 to vector<8x1xf32>
    %176 = arith.divf %174, %175 : vector<8x1xf32>
    %cst_75 = arith.constant 9.99999974E-6 : f32
    %177 = vector.broadcast %cst_75 : f32 to vector<8x1xf32>
    %178 = arith.addf %176, %177 : vector<8x1xf32>
    %179 = math.rsqrt %178 : vector<8x1xf32>
    %180 = vector.broadcast %179 : vector<8x1xf32> to vector<8x32xf32>
    %181 = arith.mulf %171, %180 : vector<8x32xf32>
    %182 = vector.broadcast %163 : vector<1x32xf32> to vector<8x32xf32>
    %183 = arith.mulf %181, %182 : vector<8x32xf32>
    %184 = vector.broadcast %165 : vector<1x32xf32> to vector<8x32xf32>
    %185 = arith.addf %183, %184 : vector<8x32xf32>
    %186 = arith.truncf %161 : vector<8x32xf32> to vector<8x32xbf16>
    %c0_76 = arith.constant 0 : index
    %c0_77 = arith.constant 0 : index
    %c0_78 = arith.constant 0 : index
    %187 = vector.load %arg15[%c0_76, %c0_77, %c0_78] : memref<1x32x64xbf16, #tpu.memory_space<vmem>>, vector<1x32x64xbf16>
    %188 = vector.shape_cast %187 : vector<1x32x64xbf16> to vector<32x64xbf16>
    %cst_79 = arith.constant dense<0.000000e+00> : vector<8x64xf32>
    %189 = tpu.matmul %186, %188, %cst_79 {dimension_numbers = #tpu.dot_dimension_numbers<[1], [0], [0], [1], [0, 0, 1, 1], [], []>} : vector<8x32xbf16>, vector<32x64xbf16>, vector<8x64xf32> -> vector<8x64xf32>
    %c0_80 = arith.constant 0 : index
    %c0_81 = arith.constant 0 : index
    %c0_82 = arith.constant 0 : index
    %190 = vector.load %arg16[%c0_80, %c0_81, %c0_82] : memref<1x1x64xf32, #tpu.memory_space<vmem>>, vector<1x1x64xf32>
    %191 = vector.shape_cast %190 : vector<1x1x64xf32> to vector<1x64xf32>
    %192 = vector.broadcast %191 : vector<1x64xf32> to vector<8x64xf32>
    %193 = arith.addf %189, %192 : vector<8x64xf32>
    %194 = arith.truncf %185 : vector<8x32xf32> to vector<8x32xbf16>
    %c0_83 = arith.constant 0 : index
    %c0_84 = arith.constant 0 : index
    %c0_85 = arith.constant 0 : index
    %195 = vector.load %arg13[%c0_83, %c0_84, %c0_85] : memref<1x32x32xbf16, #tpu.memory_space<vmem>>, vector<1x32x32xbf16>
    %196 = vector.shape_cast %195 : vector<1x32x32xbf16> to vector<32x32xbf16>
    %cst_86 = arith.constant dense<0.000000e+00> : vector<8x32xf32>
    %197 = tpu.matmul %194, %196, %cst_86 {dimension_numbers = #tpu.dot_dimension_numbers<[1], [0], [0], [1], [0, 0, 1, 1], [], []>} : vector<8x32xbf16>, vector<32x32xbf16>, vector<8x32xf32> -> vector<8x32xf32>
    %c0_87 = arith.constant 0 : index
    %c0_88 = arith.constant 0 : index
    %c0_89 = arith.constant 0 : index
    %198 = vector.load %arg14[%c0_87, %c0_88, %c0_89] : memref<1x1x32xf32, #tpu.memory_space<vmem>>, vector<1x1x32xf32>
    %199 = vector.shape_cast %198 : vector<1x1x32xf32> to vector<1x32xf32>
    %200 = vector.broadcast %199 : vector<1x32xf32> to vector<8x32xf32>
    %201 = arith.addf %197, %200 : vector<8x32xf32>
    %202 = vector.extract_strided_slice %193 {offsets = [0, 0], sizes = [8, 32], strides = [1, 1]} : vector<8x64xf32> to vector<8x32xf32>
    %203 = vector.extract_strided_slice %193 {offsets = [0, 32], sizes = [8, 32], strides = [1, 1]} : vector<8x64xf32> to vector<8x32xf32>
    %c0_90 = arith.constant 0 : index
    %c0_91 = arith.constant 0 : index
    %c0_92 = arith.constant 0 : index
    %204 = vector.load %arg17[%c0_90, %c0_91, %c0_92] : memref<1x32x32xbf16, #tpu.memory_space<vmem>>, vector<1x32x32xbf16>
    %205 = vector.shape_cast %204 : vector<1x32x32xbf16> to vector<32x32xbf16>
    %c0_93 = arith.constant 0 : index
    %c0_94 = arith.constant 0 : index
    %c0_95 = arith.constant 0 : index
    %206 = vector.load %arg18[%c0_93, %c0_94, %c0_95] : memref<1x1x32xf32, #tpu.memory_space<vmem>>, vector<1x1x32xf32>
    %207 = vector.shape_cast %206 : vector<1x1x32xf32> to vector<1x32xf32>
    %208 = vector.extract_strided_slice %201 {offsets = [0, 0], sizes = [8, 8], strides = [1, 1]} : vector<8x32xf32> to vector<8x8xf32>
    %209 = arith.truncf %208 : vector<8x8xf32> to vector<8x8xbf16>
    %210 = vector.extract_strided_slice %202 {offsets = [0, 0], sizes = [8, 8], strides = [1, 1]} : vector<8x32xf32> to vector<8x8xf32>
    %211 = arith.truncf %210 : vector<8x8xf32> to vector<8x8xbf16>
    %212 = vector.extract_strided_slice %203 {offsets = [0, 0], sizes = [8, 8], strides = [1, 1]} : vector<8x32xf32> to vector<8x8xf32>
    %213 = arith.truncf %212 : vector<8x8xf32> to vector<8x8xbf16>
    %cst_96 = arith.constant dense<0.000000e+00> : vector<8x8xf32>
    %214 = tpu.matmul %209, %211, %cst_96 {dimension_numbers = #tpu.dot_dimension_numbers<[1], [1], [0], [0], [0, 0, 1, 0], [], []>} : vector<8x8xbf16>, vector<8x8xbf16>, vector<8x8xf32> -> vector<8x8xf32>
    %cst_97 = arith.constant -1.000000e+20 : f32
    %215 = vector.shape_cast %9 : vector<1x8xi1> to vector<1x8xi1>
    %216 = vector.broadcast %215 : vector<1x8xi1> to vector<8x8xi1>
    %217 = vector.broadcast %cst_97 : f32 to vector<8x8xf32>
    %218 = arith.select %216, %214, %217 : vector<8x8xi1>, vector<8x8xf32>
    %cst_98 = arith.constant dense<0xFF800000> : vector<8xf32>
    %219 = vector.multi_reduction <maximumf>, %218, %cst_98 [1] : vector<8x8xf32> to vector<8xf32>
    %220 = vector.shape_cast %219 : vector<8xf32> to vector<8x1xf32>
    %221 = vector.broadcast %220 : vector<8x1xf32> to vector<8x8xf32>
    %222 = arith.subf %218, %221 : vector<8x8xf32>
    %223 = math.exp %222 : vector<8x8xf32>
    %cst_99 = arith.constant dense<0.000000e+00> : vector<8xf32>
    %224 = vector.multi_reduction <add>, %223, %cst_99 [1] : vector<8x8xf32> to vector<8xf32>
    %225 = vector.shape_cast %224 : vector<8xf32> to vector<8x1xf32>
    %226 = vector.broadcast %225 : vector<8x1xf32> to vector<8x8xf32>
    %227 = arith.divf %223, %226 : vector<8x8xf32>
    %228 = arith.truncf %227 : vector<8x8xf32> to vector<8x8xbf16>
    %cst_100 = arith.constant dense<0.000000e+00> : vector<8x8xf32>
    %229 = tpu.matmul %228, %213, %cst_100 {dimension_numbers = #tpu.dot_dimension_numbers<[1], [0], [0], [1], [0, 0, 1, 1], [], []>} : vector<8x8xbf16>, vector<8x8xbf16>, vector<8x8xf32> -> vector<8x8xf32>
    %230 = vector.extract_strided_slice %201 {offsets = [0, 8], sizes = [8, 8], strides = [1, 1]} : vector<8x32xf32> to vector<8x8xf32>
    %231 = arith.truncf %230 : vector<8x8xf32> to vector<8x8xbf16>
    %232 = vector.extract_strided_slice %202 {offsets = [0, 8], sizes = [8, 8], strides = [1, 1]} : vector<8x32xf32> to vector<8x8xf32>
    %233 = arith.truncf %232 : vector<8x8xf32> to vector<8x8xbf16>
    %234 = vector.extract_strided_slice %203 {offsets = [0, 8], sizes = [8, 8], strides = [1, 1]} : vector<8x32xf32> to vector<8x8xf32>
    %235 = arith.truncf %234 : vector<8x8xf32> to vector<8x8xbf16>
    %cst_101 = arith.constant dense<0.000000e+00> : vector<8x8xf32>
    %236 = tpu.matmul %231, %233, %cst_101 {dimension_numbers = #tpu.dot_dimension_numbers<[1], [1], [0], [0], [0, 0, 1, 0], [], []>} : vector<8x8xbf16>, vector<8x8xbf16>, vector<8x8xf32> -> vector<8x8xf32>
    %cst_102 = arith.constant -1.000000e+20 : f32
    %237 = vector.shape_cast %9 : vector<1x8xi1> to vector<1x8xi1>
    %238 = vector.broadcast %237 : vector<1x8xi1> to vector<8x8xi1>
    %239 = vector.broadcast %cst_102 : f32 to vector<8x8xf32>
    %240 = arith.select %238, %236, %239 : vector<8x8xi1>, vector<8x8xf32>
    %cst_103 = arith.constant dense<0xFF800000> : vector<8xf32>
    %241 = vector.multi_reduction <maximumf>, %240, %cst_103 [1] : vector<8x8xf32> to vector<8xf32>
    %242 = vector.shape_cast %241 : vector<8xf32> to vector<8x1xf32>
    %243 = vector.broadcast %242 : vector<8x1xf32> to vector<8x8xf32>
    %244 = arith.subf %240, %243 : vector<8x8xf32>
    %245 = math.exp %244 : vector<8x8xf32>
    %cst_104 = arith.constant dense<0.000000e+00> : vector<8xf32>
    %246 = vector.multi_reduction <add>, %245, %cst_104 [1] : vector<8x8xf32> to vector<8xf32>
    %247 = vector.shape_cast %246 : vector<8xf32> to vector<8x1xf32>
    %248 = vector.broadcast %247 : vector<8x1xf32> to vector<8x8xf32>
    %249 = arith.divf %245, %248 : vector<8x8xf32>
    %250 = arith.truncf %249 : vector<8x8xf32> to vector<8x8xbf16>
    %cst_105 = arith.constant dense<0.000000e+00> : vector<8x8xf32>
    %251 = tpu.matmul %250, %235, %cst_105 {dimension_numbers = #tpu.dot_dimension_numbers<[1], [0], [0], [1], [0, 0, 1, 1], [], []>} : vector<8x8xbf16>, vector<8x8xbf16>, vector<8x8xf32> -> vector<8x8xf32>
    %252 = vector.extract_strided_slice %201 {offsets = [0, 16], sizes = [8, 8], strides = [1, 1]} : vector<8x32xf32> to vector<8x8xf32>
    %253 = arith.truncf %252 : vector<8x8xf32> to vector<8x8xbf16>
    %254 = vector.extract_strided_slice %202 {offsets = [0, 16], sizes = [8, 8], strides = [1, 1]} : vector<8x32xf32> to vector<8x8xf32>
    %255 = arith.truncf %254 : vector<8x8xf32> to vector<8x8xbf16>
    %256 = vector.extract_strided_slice %203 {offsets = [0, 16], sizes = [8, 8], strides = [1, 1]} : vector<8x32xf32> to vector<8x8xf32>
    %257 = arith.truncf %256 : vector<8x8xf32> to vector<8x8xbf16>
    %cst_106 = arith.constant dense<0.000000e+00> : vector<8x8xf32>
    %258 = tpu.matmul %253, %255, %cst_106 {dimension_numbers = #tpu.dot_dimension_numbers<[1], [1], [0], [0], [0, 0, 1, 0], [], []>} : vector<8x8xbf16>, vector<8x8xbf16>, vector<8x8xf32> -> vector<8x8xf32>
    %cst_107 = arith.constant -1.000000e+20 : f32
    %259 = vector.shape_cast %9 : vector<1x8xi1> to vector<1x8xi1>
    %260 = vector.broadcast %259 : vector<1x8xi1> to vector<8x8xi1>
    %261 = vector.broadcast %cst_107 : f32 to vector<8x8xf32>
    %262 = arith.select %260, %258, %261 : vector<8x8xi1>, vector<8x8xf32>
    %cst_108 = arith.constant dense<0xFF800000> : vector<8xf32>
    %263 = vector.multi_reduction <maximumf>, %262, %cst_108 [1] : vector<8x8xf32> to vector<8xf32>
    %264 = vector.shape_cast %263 : vector<8xf32> to vector<8x1xf32>
    %265 = vector.broadcast %264 : vector<8x1xf32> to vector<8x8xf32>
    %266 = arith.subf %262, %265 : vector<8x8xf32>
    %267 = math.exp %266 : vector<8x8xf32>
    %cst_109 = arith.constant dense<0.000000e+00> : vector<8xf32>
    %268 = vector.multi_reduction <add>, %267, %cst_109 [1] : vector<8x8xf32> to vector<8xf32>
    %269 = vector.shape_cast %268 : vector<8xf32> to vector<8x1xf32>
    %270 = vector.broadcast %269 : vector<8x1xf32> to vector<8x8xf32>
    %271 = arith.divf %267, %270 : vector<8x8xf32>
    %272 = arith.truncf %271 : vector<8x8xf32> to vector<8x8xbf16>
    %cst_110 = arith.constant dense<0.000000e+00> : vector<8x8xf32>
    %273 = tpu.matmul %272, %257, %cst_110 {dimension_numbers = #tpu.dot_dimension_numbers<[1], [0], [0], [1], [0, 0, 1, 1], [], []>} : vector<8x8xbf16>, vector<8x8xbf16>, vector<8x8xf32> -> vector<8x8xf32>
    %274 = vector.extract_strided_slice %201 {offsets = [0, 24], sizes = [8, 8], strides = [1, 1]} : vector<8x32xf32> to vector<8x8xf32>
    %275 = arith.truncf %274 : vector<8x8xf32> to vector<8x8xbf16>
    %276 = vector.extract_strided_slice %202 {offsets = [0, 24], sizes = [8, 8], strides = [1, 1]} : vector<8x32xf32> to vector<8x8xf32>
    %277 = arith.truncf %276 : vector<8x8xf32> to vector<8x8xbf16>
    %278 = vector.extract_strided_slice %203 {offsets = [0, 24], sizes = [8, 8], strides = [1, 1]} : vector<8x32xf32> to vector<8x8xf32>
    %279 = arith.truncf %278 : vector<8x8xf32> to vector<8x8xbf16>
    %cst_111 = arith.constant dense<0.000000e+00> : vector<8x8xf32>
    %280 = tpu.matmul %275, %277, %cst_111 {dimension_numbers = #tpu.dot_dimension_numbers<[1], [1], [0], [0], [0, 0, 1, 0], [], []>} : vector<8x8xbf16>, vector<8x8xbf16>, vector<8x8xf32> -> vector<8x8xf32>
    %cst_112 = arith.constant -1.000000e+20 : f32
    %281 = vector.shape_cast %9 : vector<1x8xi1> to vector<1x8xi1>
    %282 = vector.broadcast %281 : vector<1x8xi1> to vector<8x8xi1>
    %283 = vector.broadcast %cst_112 : f32 to vector<8x8xf32>
    %284 = arith.select %282, %280, %283 : vector<8x8xi1>, vector<8x8xf32>
    %cst_113 = arith.constant dense<0xFF800000> : vector<8xf32>
    %285 = vector.multi_reduction <maximumf>, %284, %cst_113 [1] : vector<8x8xf32> to vector<8xf32>
    %286 = vector.shape_cast %285 : vector<8xf32> to vector<8x1xf32>
    %287 = vector.broadcast %286 : vector<8x1xf32> to vector<8x8xf32>
    %288 = arith.subf %284, %287 : vector<8x8xf32>
    %289 = math.exp %288 : vector<8x8xf32>
    %cst_114 = arith.constant dense<0.000000e+00> : vector<8xf32>
    %290 = vector.multi_reduction <add>, %289, %cst_114 [1] : vector<8x8xf32> to vector<8xf32>
    %291 = vector.shape_cast %290 : vector<8xf32> to vector<8x1xf32>
    %292 = vector.broadcast %291 : vector<8x1xf32> to vector<8x8xf32>
    %293 = arith.divf %289, %292 : vector<8x8xf32>
    %294 = arith.truncf %293 : vector<8x8xf32> to vector<8x8xbf16>
    %cst_115 = arith.constant dense<0.000000e+00> : vector<8x8xf32>
    %295 = tpu.matmul %294, %279, %cst_115 {dimension_numbers = #tpu.dot_dimension_numbers<[1], [0], [0], [1], [0, 0, 1, 1], [], []>} : vector<8x8xbf16>, vector<8x8xbf16>, vector<8x8xf32> -> vector<8x8xf32>
    %296 = tpu.concatenate %229, %251, %273, %295 in 1 : vector<8x8xf32>, vector<8x8xf32>, vector<8x8xf32>, vector<8x8xf32> -> vector<8x32xf32>
    %297 = arith.truncf %296 : vector<8x32xf32> to vector<8x32xbf16>
    %cst_116 = arith.constant dense<0.000000e+00> : vector<8x32xf32>
    %298 = tpu.matmul %297, %205, %cst_116 {dimension_numbers = #tpu.dot_dimension_numbers<[1], [0], [0], [1], [0, 0, 1, 1], [], []>} : vector<8x32xbf16>, vector<32x32xbf16>, vector<8x32xf32> -> vector<8x32xf32>
    %299 = vector.broadcast %207 : vector<1x32xf32> to vector<8x32xf32>
    %300 = arith.addf %298, %299 : vector<8x32xf32>
    %301 = arith.addf %137, %300 : vector<8x32xf32>
    %c0_117 = arith.constant 0 : index
    %c0_118 = arith.constant 0 : index
    %c0_119 = arith.constant 0 : index
    %302 = vector.load %arg19[%c0_117, %c0_118, %c0_119] : memref<1x1x32xf32, #tpu.memory_space<vmem>>, vector<1x1x32xf32>
    %303 = vector.shape_cast %302 : vector<1x1x32xf32> to vector<1x32xf32>
    %c0_120 = arith.constant 0 : index
    %c0_121 = arith.constant 0 : index
    %c0_122 = arith.constant 0 : index
    %304 = vector.load %arg20[%c0_120, %c0_121, %c0_122] : memref<1x1x32xf32, #tpu.memory_space<vmem>>, vector<1x1x32xf32>
    %305 = vector.shape_cast %304 : vector<1x1x32xf32> to vector<1x32xf32>
    %cst_123 = arith.constant dense<0.000000e+00> : vector<8xf32>
    %306 = vector.multi_reduction <add>, %301, %cst_123 [1] : vector<8x32xf32> to vector<8xf32>
    %307 = vector.shape_cast %306 : vector<8xf32> to vector<8x1xf32>
    %cst_124 = arith.constant 3.200000e+01 : f32
    %308 = vector.broadcast %cst_124 : f32 to vector<8x1xf32>
    %309 = arith.divf %307, %308 : vector<8x1xf32>
    %310 = vector.broadcast %309 : vector<8x1xf32> to vector<8x32xf32>
    %311 = arith.subf %301, %310 : vector<8x32xf32>
    %312 = arith.mulf %311, %311 : vector<8x32xf32>
    %cst_125 = arith.constant dense<0.000000e+00> : vector<8xf32>
    %313 = vector.multi_reduction <add>, %312, %cst_125 [1] : vector<8x32xf32> to vector<8xf32>
    %314 = vector.shape_cast %313 : vector<8xf32> to vector<8x1xf32>
    %cst_126 = arith.constant 3.200000e+01 : f32
    %315 = vector.broadcast %cst_126 : f32 to vector<8x1xf32>
    %316 = arith.divf %314, %315 : vector<8x1xf32>
    %cst_127 = arith.constant 9.99999974E-6 : f32
    %317 = vector.broadcast %cst_127 : f32 to vector<8x1xf32>
    %318 = arith.addf %316, %317 : vector<8x1xf32>
    %319 = math.rsqrt %318 : vector<8x1xf32>
    %320 = vector.broadcast %319 : vector<8x1xf32> to vector<8x32xf32>
    %321 = arith.mulf %311, %320 : vector<8x32xf32>
    %322 = vector.broadcast %303 : vector<1x32xf32> to vector<8x32xf32>
    %323 = arith.mulf %321, %322 : vector<8x32xf32>
    %324 = vector.broadcast %305 : vector<1x32xf32> to vector<8x32xf32>
    %325 = arith.addf %323, %324 : vector<8x32xf32>
    %326 = arith.truncf %325 : vector<8x32xf32> to vector<8x32xbf16>
    %c0_128 = arith.constant 0 : index
    %c0_129 = arith.constant 0 : index
    %c0_130 = arith.constant 0 : index
    %327 = vector.load %arg21[%c0_128, %c0_129, %c0_130] : memref<1x32x64xbf16, #tpu.memory_space<vmem>>, vector<1x32x64xbf16>
    %328 = vector.shape_cast %327 : vector<1x32x64xbf16> to vector<32x64xbf16>
    %cst_131 = arith.constant dense<0.000000e+00> : vector<8x64xf32>
    %329 = tpu.matmul %326, %328, %cst_131 {dimension_numbers = #tpu.dot_dimension_numbers<[1], [0], [0], [1], [0, 0, 1, 1], [], []>} : vector<8x32xbf16>, vector<32x64xbf16>, vector<8x64xf32> -> vector<8x64xf32>
    %c0_132 = arith.constant 0 : index
    %c0_133 = arith.constant 0 : index
    %c0_134 = arith.constant 0 : index
    %330 = vector.load %arg22[%c0_132, %c0_133, %c0_134] : memref<1x1x64xf32, #tpu.memory_space<vmem>>, vector<1x1x64xf32>
    %331 = vector.shape_cast %330 : vector<1x1x64xf32> to vector<1x64xf32>
    %332 = vector.broadcast %331 : vector<1x64xf32> to vector<8x64xf32>
    %333 = arith.addf %329, %332 : vector<8x64xf32>
    %cst_135 = arith.constant 0.000000e+00 : f32
    %334 = vector.broadcast %cst_135 : f32 to vector<8x64xf32>
    %335 = arith.maximumf %333, %334 : vector<8x64xf32>
    %336 = arith.truncf %335 : vector<8x64xf32> to vector<8x64xbf16>
    %c0_136 = arith.constant 0 : index
    %c0_137 = arith.constant 0 : index
    %c0_138 = arith.constant 0 : index
    %337 = vector.load %arg23[%c0_136, %c0_137, %c0_138] : memref<1x64x32xbf16, #tpu.memory_space<vmem>>, vector<1x64x32xbf16>
    %338 = vector.shape_cast %337 : vector<1x64x32xbf16> to vector<64x32xbf16>
    %cst_139 = arith.constant dense<0.000000e+00> : vector<8x32xf32>
    %339 = tpu.matmul %336, %338, %cst_139 {dimension_numbers = #tpu.dot_dimension_numbers<[1], [0], [0], [1], [0, 0, 1, 1], [], []>} : vector<8x64xbf16>, vector<64x32xbf16>, vector<8x32xf32> -> vector<8x32xf32>
    %c0_140 = arith.constant 0 : index
    %c0_141 = arith.constant 0 : index
    %c0_142 = arith.constant 0 : index
    %340 = vector.load %arg24[%c0_140, %c0_141, %c0_142] : memref<1x1x32xf32, #tpu.memory_space<vmem>>, vector<1x1x32xf32>
    %341 = vector.shape_cast %340 : vector<1x1x32xf32> to vector<1x32xf32>
    %342 = vector.broadcast %341 : vector<1x32xf32> to vector<8x32xf32>
    %343 = arith.addf %339, %342 : vector<8x32xf32>
    %344 = arith.addf %301, %343 : vector<8x32xf32>
    %c0_143 = arith.constant 0 : index
    %c0_144 = arith.constant 0 : index
    %345 = vector.load %arg26[%c0_143, %c0_144] : memref<8x32xf32, #tpu.memory_space<vmem>>, vector<8x32xf32>
    tpu.vector_store %arg26[%c0_143, %c0_144], %344 {strides = array<i32>} : memref<8x32xf32, #tpu.memory_space<vmem>>, vector<8x32xf32>,
    %c1_i32 = arith.constant 1 : i32
    %346 = arith.cmpi eq, %arg1, %c1_i32 : i32
    %347 = arith.extui %346 : i1 to i32
    %c0_i32_145 = arith.constant 0 : i32
    %348 = arith.cmpi ne, %347, %c0_i32_145 : i32
    scf.if %348 {
      %c0_146 = arith.constant 0 : index
      %c0_147 = arith.constant 0 : index
      %c0_148 = arith.constant 0 : index
      %349 = vector.load %arg25[%c0_146, %c0_147, %c0_148] : memref<1x8x32xf32, #tpu.memory_space<vmem>>, vector<1x8x32xf32>
      %350 = vector.shape_cast %349 : vector<1x8x32xf32> to vector<8x32xf32>
      %351 = vector.shape_cast %344 : vector<8x32xf32> to vector<1x8x32xf32>
      tpu.vector_store %arg25[%c0_146, %c0_147, %c0_148], %351 {strides = array<i32>} : memref<1x8x32xf32, #tpu.memory_space<vmem>>, vector<1x8x32xf32>,
    } else {
    }
    return
  }
  func.func @transform_0(%arg0: i32, %arg1: i32) -> (i32, i32, i32) {
    %c0_i32 = arith.constant 0 : i32
    %c0_i32_0 = arith.constant 0 : i32
    %c0_i32_1 = arith.constant 0 : i32
    return %arg0, %c0_i32, %c0_i32_0 : i32, i32, i32
  }
  func.func @transform_1(%arg0: i32, %arg1: i32) -> (i32, i32, i32) {
    %c0_i32 = arith.constant 0 : i32
    %c0_i32_0 = arith.constant 0 : i32
    %c0_i32_1 = arith.constant 0 : i32
    return %arg0, %c0_i32, %c0_i32_0 : i32, i32, i32
  }
  func.func @transform_2(%arg0: i32, %arg1: i32) -> (i32, i32, i32, i32) {
    %c0_i32 = arith.constant 0 : i32
    %c0_i32_0 = arith.constant 0 : i32
    %c0_i32_1 = arith.constant 0 : i32
    %c0_i32_2 = arith.constant 0 : i32
    return %arg0, %c0_i32, %c0_i32_0, %c0_i32_1 : i32, i32, i32, i32
  }
  func.func @transform_3(%arg0: i32, %arg1: i32) -> (i32, i32, i32) {
    %c0_i32 = arith.constant 0 : i32
    %c0_i32_0 = arith.constant 0 : i32
    %c0_i32_1 = arith.constant 0 : i32
    return %arg1, %c0_i32, %c0_i32_0 : i32, i32, i32
  }
  func.func @transform_4(%arg0: i32, %arg1: i32) -> (i32, i32, i32) {
    %c0_i32 = arith.constant 0 : i32
    %c0_i32_0 = arith.constant 0 : i32
    %c0_i32_1 = arith.constant 0 : i32
    return %arg1, %c0_i32, %c0_i32_0 : i32, i32, i32
  }
  func.func @transform_5(%arg0: i32, %arg1: i32) -> (i32, i32, i32) {
    %c0_i32 = arith.constant 0 : i32
    %c0_i32_0 = arith.constant 0 : i32
    %c0_i32_1 = arith.constant 0 : i32
    return %arg1, %c0_i32, %c0_i32_0 : i32, i32, i32
  }
  func.func @transform_6(%arg0: i32, %arg1: i32) -> (i32, i32, i32) {
    %c0_i32 = arith.constant 0 : i32
    %c0_i32_0 = arith.constant 0 : i32
    %c0_i32_1 = arith.constant 0 : i32
    return %arg1, %c0_i32, %c0_i32_0 : i32, i32, i32
  }
  func.func @transform_7(%arg0: i32, %arg1: i32) -> (i32, i32, i32) {
    %c0_i32 = arith.constant 0 : i32
    %c0_i32_0 = arith.constant 0 : i32
    %c0_i32_1 = arith.constant 0 : i32
    return %arg1, %c0_i32, %c0_i32_0 : i32, i32, i32
  }
  func.func @transform_8(%arg0: i32, %arg1: i32) -> (i32, i32, i32) {
    %c0_i32 = arith.constant 0 : i32
    %c0_i32_0 = arith.constant 0 : i32
    %c0_i32_1 = arith.constant 0 : i32
    return %arg1, %c0_i32, %c0_i32_0 : i32, i32, i32
  }
  func.func @transform_9(%arg0: i32, %arg1: i32) -> (i32, i32, i32) {
    %c0_i32 = arith.constant 0 : i32
    %c0_i32_0 = arith.constant 0 : i32
    %c0_i32_1 = arith.constant 0 : i32
    return %arg1, %c0_i32, %c0_i32_0 : i32, i32, i32
  }
  func.func @transform_10(%arg0: i32, %arg1: i32) -> (i32, i32, i32) {
    %c0_i32 = arith.constant 0 : i32
    %c0_i32_0 = arith.constant 0 : i32
    %c0_i32_1 = arith.constant 0 : i32
    return %arg1, %c0_i32, %c0_i32_0 : i32, i32, i32
  }
  func.func @transform_11(%arg0: i32, %arg1: i32) -> (i32, i32, i32) {
    %c0_i32 = arith.constant 0 : i32
    %c0_i32_0 = arith.constant 0 : i32
    %c0_i32_1 = arith.constant 0 : i32
    return %arg1, %c0_i32, %c0_i32_0 : i32, i32, i32
  }
  func.func @transform_12(%arg0: i32, %arg1: i32) -> (i32, i32, i32) {
    %c0_i32 = arith.constant 0 : i32
    %c0_i32_0 = arith.constant 0 : i32
    %c0_i32_1 = arith.constant 0 : i32
    return %arg1, %c0_i32, %c0_i32_0 : i32, i32, i32
  }
  func.func @transform_13(%arg0: i32, %arg1: i32) -> (i32, i32, i32) {
    %c0_i32 = arith.constant 0 : i32
    %c0_i32_0 = arith.constant 0 : i32
    %c0_i32_1 = arith.constant 0 : i32
    return %arg1, %c0_i32, %c0_i32_0 : i32, i32, i32
  }
  func.func @transform_14(%arg0: i32, %arg1: i32) -> (i32, i32, i32) {
    %c0_i32 = arith.constant 0 : i32
    %c0_i32_0 = arith.constant 0 : i32
    %c0_i32_1 = arith.constant 0 : i32
    return %arg1, %c0_i32, %c0_i32_0 : i32, i32, i32
  }
  func.func @transform_15(%arg0: i32, %arg1: i32) -> (i32, i32, i32) {
    %c0_i32 = arith.constant 0 : i32
    %c0_i32_0 = arith.constant 0 : i32
    %c0_i32_1 = arith.constant 0 : i32
    return %arg1, %c0_i32, %c0_i32_0 : i32, i32, i32
  }
  func.func @transform_16(%arg0: i32, %arg1: i32) -> (i32, i32, i32) {
    %c0_i32 = arith.constant 0 : i32
    %c0_i32_0 = arith.constant 0 : i32
    %c0_i32_1 = arith.constant 0 : i32
    return %arg1, %c0_i32, %c0_i32_0 : i32, i32, i32
  }
  func.func @transform_17(%arg0: i32, %arg1: i32) -> (i32, i32, i32) {
    %c0_i32 = arith.constant 0 : i32
    %c0_i32_0 = arith.constant 0 : i32
    %c0_i32_1 = arith.constant 0 : i32
    return %arg1, %c0_i32, %c0_i32_0 : i32, i32, i32
  }
  func.func @transform_18(%arg0: i32, %arg1: i32) -> (i32, i32, i32) {
    %c0_i32 = arith.constant 0 : i32
    %c0_i32_0 = arith.constant 0 : i32
    %c0_i32_1 = arith.constant 0 : i32
    return %arg1, %c0_i32, %c0_i32_0 : i32, i32, i32
  }
  func.func @transform_19(%arg0: i32, %arg1: i32) -> (i32, i32, i32) {
    %c0_i32 = arith.constant 0 : i32
    %c0_i32_0 = arith.constant 0 : i32
    %c0_i32_1 = arith.constant 0 : i32
    return %arg1, %c0_i32, %c0_i32_0 : i32, i32, i32
  }
  func.func @transform_20(%arg0: i32, %arg1: i32) -> (i32, i32, i32) {
    %c0_i32 = arith.constant 0 : i32
    %c0_i32_0 = arith.constant 0 : i32
    %c0_i32_1 = arith.constant 0 : i32
    return %arg1, %c0_i32, %c0_i32_0 : i32, i32, i32
  }
  func.func @transform_21(%arg0: i32, %arg1: i32) -> (i32, i32, i32) {
    %c0_i32 = arith.constant 0 : i32
    %c0_i32_0 = arith.constant 0 : i32
    %c0_i32_1 = arith.constant 0 : i32
    return %arg1, %c0_i32, %c0_i32_0 : i32, i32, i32
  }
  func.func @transform_22(%arg0: i32, %arg1: i32) -> (i32, i32, i32) {
    %c0_i32 = arith.constant 0 : i32
    %c0_i32_0 = arith.constant 0 : i32
    %c0_i32_1 = arith.constant 0 : i32
    return %arg1, %c0_i32, %c0_i32_0 : i32, i32, i32
  }
  func.func @transform_23(%arg0: i32, %arg1: i32) -> (i32, i32, i32) {
    %c0_i32 = arith.constant 0 : i32
    %c0_i32_0 = arith.constant 0 : i32
    %c0_i32_1 = arith.constant 0 : i32
    return %arg0, %c0_i32, %c0_i32_0 : i32, i32, i32
  }
}

</mosaic_0001>

<bundles_post_ra>
// kernel: decoder_fwd.3
= control target key start
LH: loop header
LB: loop body
LE: loop exit
PB: predicated region body
PF: predicated region fallthrough
CT: control target
= control target key end

     0   :  { %s160_s0 = inlined_call_operand.vmem [shape: f32[16,32], index: 0, kind: input, shape index: {}]   ;;  %s161_s1 = inlined_call_operand.vmem [shape: bf16[32,50], index: 1, kind: input, shape index: {}]   ;;  %s162_s2 = inlined_call_operand.vmem [shape: f32[1,50], index: 2, kind: input, shape index: {}]   ;;  %s163_s3 = inlined_call_operand.hbm [shape: f32[16,50], index: 3, kind: output, shape index: {}]  }
   0x1   :  { %v88_v0 = vld [vmem:[%s161_s1 + $0x8] sm:$0xff]  ;;  %v87_v1 = vld [vmem:[%s161_s1] sm:$0xff] }
   0x2   :  { %49 = vmatpush.bf16.msra.mxu0 %v88_v0  ;;  %v16_v2 = vld [vmem:[%s160_s0] sm:$0xff]  ;;  %v17_v3 = vld [vmem:[%s160_s0 + $0x8] sm:$0xff] }
   0x3   :  { %8 = vsyncpa [#allocation3], 0  ;;  %v18_v4 = vpack.c.bf16 %v17_v3, %v16_v2  ;;  %vm39_vm0 = vcmask 261120   ;;  %v92_v5 = vld [vmem:[%s162_s2] ss:$0 sm:$0xff]  ;;  %vm57_vm1 = vcmask 408576  }
   0x4   :  { %s119_s1 = smov [#allocation2]   ;;  %s66_s25 = sshll.u32 %s163_s3, 4  ;;  %s67_s25 = int_to_ptr.hbm [resolvable:$true] %s66_s25 }
   0x5   :  { %s64_s22 = sshll.u32 %s119_s1, 4  ;;  %s120_s0 = smov 128   ;;  %s65_s22 = int_to_ptr.vmem [resolvable:$true] %s64_s22 }
   0x6   :  { %50 = vmatpush.bf16.msra.mxu0 %v87_v1  ;;  %s121_s26 = smov 8  }
   0x9   :  { %86 = vmatmul.msk.bf16.vlgmr.msra.gmra.mxu0 %vm39_vm0, %v18_v4 }
  0x86   :  { %v52_v6 = vpop.f32.mrf.mxu0 }
  0x87   :  { %v53_v7 = vadd.f32 %v92_v5, %v52_v6 }
  0x89   :  { %58 = vst.msk [vmem:[#allocation2] sm:$0xff] %vm57_vm1, %v53_v7 }
  0x8e   :  { %v54_v8 = vpop.f32.mrf.mxu0 }
  0x8f   :  { %v55_v9 = vadd.f32 %v92_v5, %v54_v8 }
  0x91   :  { %59 = vst.msk [vmem:[#allocation2 + $0x8] sm:$0xff] %vm57_vm1, %v55_v9 }
  0x92   :  { %72 = dma.vmem_to_hbm [thread:$0]  %s65_s22, 256, %s67_s25, [#allocation3], %s120_s0, %s120_s0, %s121_s26  }
  0x93   :  { %117 = dma.done.wait [#allocation3], 256  }
  0x94   :  { %118 = vsyncadd [#allocation3], 4294967040 }
  0x95   :  { %77 = vsyncpa [#allocation3], 1 }

// kernel: decoder_fwd.2
= control target key start
LH: loop header
LB: loop body
LE: loop exit
PB: predicated region body
PF: predicated region fallthrough
CT: control target
= control target key end

     0   :  { %s2810_s30 = smov 0   ;;  %s2812_s24 = smov 0   ;;  %s3244_s0 = inlined_call_operand.vmem [shape: f32[2,8,32], index: 0, kind: input, shape index: {}]   ;;  %s3245_s1 = inlined_call_operand.vmem [shape: f32[2,8,32], index: 1, kind: input, shape index: {}]   ;;  %s3246_s2 = inlined_call_operand.vmem [shape: f32[2,1,1,8], index: 2, kind: input, shape index: {}]   ;;  %s3247_s3 = inlined_call_operand.vmem [shape: f32[2,1,32], index: 3, kind: input, shape index: {}]   ;;  %s3248_s4 = inlined_call_operand.vmem [shape: f32[2,1,32], index: 4, kind: input, shape index: {}]   ;;  %s3249_s5 = inlined_call_operand.vmem [shape: bf16[2,32,96], index: 5, kind: input, shape index: {}]   ;;  %s3250_s6 = inlined_call_operand.vmem [shape: f32[2,1,96], index: 6, kind: input, shape index: {}]   ;;  %s3251_s7 = inlined_call_operand.vmem [shape: bf16[2,32,32], index: 7, kind: input, shape index: {}]   ;;  %s3252_s8 = inlined_call_operand.vmem [shape: f32[2,1,32], index: 8, kind: input, shape index: {}]   ;;  %s3253_s9 = inlined_call_operand.vmem [shape: f32[2,1,32], index: 9, kind: input, shape index: {}]   ;;  %s3254_s10 = inlined_call_operand.vmem [shape: f32[2,1,32], index: 10, kind: input, shape index: {}]   ;;  %s3255_s11 = inlined_call_operand.vmem [shape: bf16[2,32,32], index: 11, kind: input, shape index: {}]   ;;  %s3256_s12 = inlined_call_operand.vmem [shape: f32[2,1,32], index: 12, kind: input, shape index: {}]   ;;  %s3257_s13 = inlined_call_operand.vmem [shape: bf16[2,32,64], index: 13, kind: input, shape index: {}]   ;;  %s3258_s14 = inlined_call_operand.vmem [shape: f32[2,1,64], index: 14, kind: input, shape index: {}]   ;;  %s3259_s15 = inlined_call_operand.vmem [shape: bf16[2,32,32], index: 15, kind: input, shape index: {}]   ;;  %s3260_s16 = inlined_call_operand.vmem [shape: f32[2,1,32], index: 16, kind: input, shape index: {}]   ;;  %s3261_s17 = inlined_call_operand.vmem [shape: f32[2,1,32], index: 17, kind: input, shape index: {}]   ;;  %s3262_s18 = inlined_call_operand.vmem [shape: f32[2,1,32], index: 18, kind: input, shape index: {}]   ;;  %s3263_s19 = inlined_call_operand.vmem [shape: bf16[2,32,64], index: 19, kind: input, shape index: {}]   ;;  %s3264_s20 = inlined_call_operand.vmem [shape: f32[2,1,64], index: 20, kind: input, shape index: {}]   ;;  %s3265_s21 = inlined_call_operand.vmem [shape: bf16[2,64,32], index: 21, kind: input, shape index: {}]   ;;  %s3266_s22 = inlined_call_operand.vmem [shape: f32[2,1,32], index: 22, kind: input, shape index: {}]   ;;  %s3267_s23 = inlined_call_operand.vmem [shape: f32[2,8,32], index: 23, kind: output, shape index: {}]  }
   0x1   :  { %3275 = sst [smem:[#allocation12_spill]] %s3244_s0  ;;  %s2814_s25 = smov 0  }
   0x2   :  { %3276 = sst [smem:[#allocation13_spill]] %s3245_s1 }
   0x3   :  { %3277 = sst [smem:[#allocation14_spill]] %s3246_s2 }
   0x4   :  { %3278 = sst [smem:[#allocation15_spill]] %s3247_s3 }
   0x5   :  { %3279 = sst [smem:[#allocation16_spill]] %s3248_s4  ;;  %s2808_s4 = smov 0  }
   0x6   :  { %3280 = sst [smem:[#allocation17_spill]] %s3249_s5  ;;  %s2816_s5 = smov 0  }
   0x7   :  { %3281 = sst [smem:[#allocation18_spill]] %s3250_s6 }
   0x8   :  { %3282 = sst [smem:[#allocation19_spill]] %s3251_s7 }
   0x9   :  { %3283 = sst [smem:[#allocation20_spill]] %s3255_s11 }
   0xa   :  { %3284 = sst [smem:[#allocation21_spill]] %s3256_s12 }
   0xb   :  { %3285 = sst [smem:[#allocation22_spill]] %s3257_s13 }
   0xc   :  { %3286 = sst [smem:[#allocation23_spill]] %s3258_s14 }
   0xd   :  { %3287 = sst [smem:[#allocation24_spill]] %s3259_s15 }
   0xe   :  { %3288 = sst [smem:[#allocation25_spill]] %s3260_s16 }
   0xf   :  { %3289 = sst [smem:[#allocation26_spill]] %s3262_s18 }
  0x10   :  { %3290 = sst [smem:[#allocation27_spill]] %s3263_s19 }
  0x11   :  { %3291 = sst [smem:[#allocation28_spill]] %s3264_s20 }
  0x12   :  { %3292 = sst [smem:[#allocation29_spill]] %s3265_s21 }
  0x13   :  { %3293 = sst [smem:[#allocation30_spill]] %s3266_s22 }
  0x14   :  { %3294 = sst [smem:[#allocation31_spill]] %s3267_s23 }
  0x15 LB: > { %3295 = sst [smem:[#allocation3_spill]] %s2654_s4  ;;  %s42_s1 = sadd.s32 1, %s2662_s24  ;;  %s2670_s5 = sphi %s2816_s5, %s33_s5   ;;  %s2666_s25 = sphi %s2814_s25, %s3360_s25   ;;  %s2662_s24 = sphi %s2812_s24, %s3359_s24   ;;  %s2658_s30 = sphi %s2810_s30, %s3358_s30   ;;  %s2654_s4 = sphi %s2808_s4, %s3357_s4  }
  0x16   : > { %3296 = sst [smem:[#allocation4_spill]] %s2662_s24  ;;  %s45_s26 = sadd.s32 1, %s2666_s25 }
  0x17   : > { %3297 = sst [smem:[#allocation5_spill]] %s2666_s25  ;;  %p43_p0 = scmp.ge.s32.totalorder %s42_s1, 2 }
  0x18   : > { %3298 = sst [smem:[#allocation6_spill]] %s2670_s5  ;;  %p2389_p1 = scmp.ge.s32.totalorder %s2670_s5, 1 }
  0x19   : > { %p839_p2 = scmp.lt.s32.totalorder %s2670_s5, 5  ;;  %s3362_s1 = smov (%p43_p0, %s42_s1), 0 }
  0x1a   : > { %3299 = sst [smem:[#allocation7_spill]] %s3362_s1  ;;  %s3364_s26 = smov (!%p43_p0, %s45_s26), %s2666_s25 }
  0x1b   : > { %p840_p3 = pnand %p2389_p1, %p839_p2  ;;  %p47_p4 = scmp.ge.s32.totalorder %s3364_s26, 2 }
  0x1d   : > { %s3366_s26 = smov (%p47_p4, %s3364_s26), 0  ;;  %843 = sbr.rel (%p840_p3) target bundleno = 3233 (0xca1), region = 112 }
  0x1e   : > { %3300 = sst [smem:[#allocation8_spill]] %s3366_s26 }
  0x22   : > { %p982_p5 = scmp.lt.s32.totalorder %s2658_s30, 1  ;;  %p993_p6 = scmp.lt.s32.totalorder %s2654_s4, 1 }
  0x23   : > { %s3303_s26 = sld [smem:[#allocation12_spill]] }
  0x24   : > { %s3368_s30 = smov (!%p982_p5, %s2658_s30), 1  ;;  %s3308_s25 = sld [smem:[#allocation17_spill]] }
  0x25   : > { %3301 = sst [smem:[#allocation9_spill]] %s3368_s30  ;;  %s2847_s6 = sshll.u32 %s3368_s30, 3 }
  0x26   : > { %s2844_s2 = scalar_select %p993_p6, %s2654_s4, 1 }
  0x27   : > { %s3309_s21 = sld [smem:[#allocation19_spill]] }
  0x28   : > { %s2498_s28 = sshll.u32 %s2844_s2, 4  ;;  %s3310_s11 = sld [smem:[#allocation20_spill]] }
  0x29   : > { %s985_s1 = scalar_lea.vmem %s3303_s26, %s2847_s6  ;;  %s3313_s13 = sld [smem:[#allocation22_spill]] }
  0x2a   : > { %s2877_s5 = scalar_lea.vmem %s3308_s25, %s2498_s28  ;;  %s3315_s15 = sld [smem:[#allocation24_spill]] }
  0x2b   : > { %s3319_s30 = sld [smem:[#allocation27_spill]]  ;;  %s2504_s14 = sshll.u32 %s2844_s2, 5 }
  0x2c   : > { %s3322_s19 = sld [smem:[#allocation30_spill]] }
  0x2d   : > { %s2882_s4 = scalar_lea.vmem %s3309_s21, %s2498_s28  ;;  %s3323_s12 = sld [smem:[#allocation31_spill]] }
  0x2e   : > { %s2899_s22 = scalar_lea.vmem %s3310_s11, %s2498_s28  ;;  %s3321_s11 = sld [smem:[#allocation29_spill]] }
  0x2f   : > { %3311 = sst [smem:[#allocation10_spill]] %s2899_s22  ;;  %s2908_s20 = scalar_lea.vmem %s3313_s13, %s2498_s28 }
  0x30   : > { %s2917_s24 = scalar_lea.vmem %s3315_s15, %s2498_s28  ;;  %s3320_s15 = sld [smem:[#allocation28_spill]] }
  0x31   : > { %3316 = sst [smem:[#allocation11_spill]] %s2917_s24  ;;  %s2934_s29 = scalar_lea.vmem %s3319_s30, %s2498_s28 }
  0x32   : > { %s1066_s7 = scalar_lea.vmem %s3322_s19, %s2844_s2  ;;  %s3324_s28 = sld [smem:[#allocation3_spill]] }
  0x33   : > { %s1070_s22 = scalar_lea.vmem %s3323_s12, %s2847_s6 }
  0x34   : > { %s2944_s16 = scalar_lea.vmem %s3321_s11, %s2504_s14 }
  0x36   : > { %s1058_s24 = scalar_lea.vmem %s3320_s15, %s2844_s2 }
  0x38   : > { %p2407_p7 = scmp.ne.s32.totalorder %s3324_s28, 0 }
  0x3a   : > { %1075 = sbr.rel (%p2407_p7) target bundleno = 65 (0x41), region = 116 }
  0x3f   : > { %v1076_v0 = vld [vmem:[%s985_s1] sm:$0xff]  ;;  %vm1077_vm0 = vcmask 261120  }
  0x40   : > { %1078 = vst.msk [vmem:[#allocation2] sm:$0xff] %vm1077_vm0, %v1076_v0 }
  0x41 PF: > { %vm1090_vm1 = vcmask 261120   ;;  %v2672_v3 = vmov 32.0   ;;  %v2506_v15 = vld [vmem:[%s2877_s5 + $0x8] sm:$0xff]  ;;  %v2505_v16 = vld [vmem:[%s2877_s5] sm:$0xff]  ;;  %s3325_s14 = sld [smem:[#allocation15_spill]]  ;;  %s2673_s25 = smov 104   ;;  %v1083_v49 = vlaneseq }
  0x42   : > { %2590 = vrcp.f32 %v2672_v3  ;;  %1158 = vmatpush.bf16.msra.mxu0 %v2506_v15  ;;  %s3327_s19 = sld [smem:[#allocation16_spill]]  ;;  %s2674_s23 = smov 120   ;;  %vm1174_vm6 = vcmask 64512   ;;  %vm1225_vm12 = vcmask 1043456  }
  0x43   : > { %s3329_s0 = sld [smem:[#allocation18_spill]]  ;;  %s2675_s21 = smov 96   ;;  %v1084_v50 = vshrl.u32 %v1083_v49, 7  ;;  %v1086_v51 = vand.u32 127, %v1083_v49 }
  0x44   : > { %s2676_s13 = smov 72   ;;  %s2677_s27 = smov 88  }
  0x45   : > { %s2678_s28 = smov 112   ;;  %s2679_s11 = smov 80   ;;  %vm1087_vm7 = vcmp.ge.s32.totalorder %v1084_v50, %v1086_v51 }
  0x46   : > { %1159 = vmatpush.bf16.msra.mxu0 %v2505_v16  ;;  %s2680_s12 = smov 64   ;;  %s2683_s1 = smov 40  }
  0x47   : > { %v2955_v1 = vld [vmem:[#allocation2] sm:$0xff]  ;;  %s3326_s15 = scalar_lea.vmem %s3325_s14, %s2844_s2  ;;  %s2681_s14 = smov 48  }
  0x48   : > { %v1091_v2 = vsel %vm1090_vm1, %v2955_v1, 0.0  ;;  %v2591_v4 = vpop.eup %2590  ;;  %v2577_v26 = vld [vmem:[%s3326_s15] ss:$0 sm:$0xff]  ;;  %s3328_s18 = scalar_lea.vmem %s3327_s19, %s2844_s2  ;;  %s2682_s15 = smov 56  }
  0x49   : > { %1092 = vadd.xlane.f32.xlu0 %v1091_v2  ;;  %v1095_v5 = vmul.f32 32.0, %v2591_v4  ;;  %vm1099_vm2 = vweird.f32 %v2591_v4  ;;  %v2578_v29 = vld [vmem:[%s3328_s18] ss:$0 sm:$0xff]  ;;  %s3330_s26 = scalar_lea.vmem %s3329_s0, %s2844_s2  ;;  %s3331_s18 = sld [smem:[#allocation13_spill]] }
  0x4a   : > { %v2579_v33 = vld [vmem:[%s3330_s26] ss:$0 sm:$0xff]  ;;  %s2684_s3 = smov 16   ;;  %s2685_s0 = smov 8  }
  0x4b   : > { %v1096_v6 = vsub.f32 1.0, %v1095_v5  ;;  %s2686_s26 = smov 24   ;;  %s3339_s5 = sld [smem:[#allocation21_spill]] }
  0x4d   : > { %v1097_v7 = vmul.f32 %v2591_v4, %v1096_v6 }
  0x4f   : > { %v1098_v8 = vadd.f32 %v2591_v4, %v1097_v7  ;;  %s3332_s30 = scalar_lea.vmem %s3331_s18, %s2847_s6  ;;  %s3335_s18 = scalar_lea.vmem %s3254_s10, %s2844_s2 }
  0x51   : > { %v2959_v9 = vsel %vm1099_vm2, %v2591_v4, %v1098_v8  ;;  %s3340_s19 = scalar_lea.vmem %s3339_s5, %s2844_s2 }
  0xbc   : > { %v1093_v10 = vpop.xlane.xlu0 %1092 }
  0xbd   : > { %v1101_v11 = vmul.f32 %v2959_v9, %v1093_v10 }
  0xbf   : > { %v1102_v12 = vsub.f32 %v2955_v1, %v1101_v11 }
  0xc1   : > { %v1103_v13 = vmul.f32 %v1102_v12, %v1102_v12 }
  0xc3   : > { %v1104_v14 = vsel %vm1090_vm1, %v1103_v13, 0.0 }
  0xc4   : > { %1105 = vadd.xlane.f32.xlu0 %v1104_v14 }
 0x137   : > { %v1106_v17 = vpop.xlane.xlu0 %1105 }
 0x138   : > { %v1107_v18 = vmul.f32 %v1106_v17, %v2959_v9 }
 0x13a   : > { %v1108_v19 = vadd.f32 1e-05, %v1107_v18 }
 0x13c   : > { %2592 = vrsqrt.f32 %v1108_v19  ;;  %vm1115_vm4 = vweird.f32 %v1108_v19 }
 0x142   : > { %v2593_v20 = vpop.eup %2592 }
 0x143   : > { %v1110_v21 = vmul.f32 %v2593_v20, %v1108_v19  ;;  %vm1116_vm3 = vweird.f32 %v2593_v20 }
 0x144   : > { %vm1117_vm5 = vmor %vm1115_vm4, %vm1116_vm3 }
 0x145   : > { %v1111_v22 = vmul.f32 %v2593_v20, %v1110_v21 }
 0x147   : > { %v1112_v23 = vmul.f32 0.5, %v1111_v22 }
 0x149   : > { %v1113_v24 = vsub.f32 1.5, %v1112_v23 }
 0x14b   : > { %v1114_v25 = vmul.f32 %v2593_v20, %v1113_v24 }
 0x14d   : > { %v1118_v27 = vsel %vm1117_vm5, %v2593_v20, %v1114_v25 }
 0x14e   : > { %v1119_v28 = vmul.f32 %v1118_v27, %v1102_v12 }
 0x150   : > { %v1123_v30 = vmul.f32 %v2577_v26, %v1119_v28 }
 0x152   : > { %v1127_v31 = vadd.f32 %v2578_v29, %v1123_v30 }
 0x154   : > { %v1128_v32 = vpack.c.bf16 %v1127_v31, %v1127_v31 }
 0x156   : > { %2416 = vmatmul.msk.bf16.vlgmr.msra.gmra.mxu0 %vm1090_vm1, %v1128_v32 }
 0x1d3   : > { %v1161_v34 = vpop.f32.mrf.mxu0 }
 0x1d4   : > { %v1162_v35 = vadd.f32 %v2579_v33, %v1161_v34 }
 0x1d6   : > { %v2983_v36 = vpack.c.bf16 %v1162_v35, %v1162_v35 }
 0x1d8   : > { %1382 = vrot.lane.b32.xlu0 %v2983_v36, %s2673_s25  ;;  %1242 = vrot.lane.b32.xlu2 %v2983_v36, %s2674_s23 }
 0x1d9   : > { %1172 = vrot.lane.b32.xlu1 %v2983_v36, %s2675_s21 }
 0x1db   : > { %v1163_v37 = vpop.f32.mrf.mxu0 }
 0x1e0   : > { %1384 = vrot.lane.b32.xlu2 %v2983_v36, %s2676_s13 }
 0x1e1   : > { %1244 = vrot.lane.b32.xlu1 %v2983_v36, %s2677_s27 }
 0x1e8   : > { %1312 = vrot.lane.b32.xlu2 %v2983_v36, %s2678_s28 }
 0x1e9   : > { %1314 = vrot.lane.b32.xlu1 %v2983_v36, %s2679_s11 }
 0x232   : > { %v1243_v38 = vpop.permute.xlu2 %1242 }
 0x23a   : > { %v1385_v41 = vpop.permute.xlu2 %1384 }
 0x23b   : > { %v1390_v44 = vsel %vm1174_vm6, %v1385_v41, 0 }
 0x242   : > { %v1313_v47 = vpop.permute.xlu2 %1312 }
 0x24a   : > { %v1383_v48 = vpop.permute.xlu0 %1382 }
 0x24b   : > { %v1173_v39 = vpop.permute.xlu1 %1172 }
 0x24c   : > { %v1179_v40 = vsel %vm1174_vm6, %v1173_v39, 0 }
 0x24d   : > { %1188 = vmatpush.bf16.xpose.msra.mxu1 %v1179_v40 }
 0x253   : > { %v1245_v42 = vpop.permute.xlu1 %1244 }
 0x254   : > { %2417 = vmatmul.msk.bf16.vlgmr.msra.gmra.mxu1 %vm1174_vm6, %v2983_v36  ;;  %v1250_v43 = vsel %vm1174_vm6, %v1245_v42, 0 }
 0x255   : > { %1259 = vmatpush.bf16.xpose.msra.mxu3 %v1250_v43 }
 0x25b   : > { %v1315_v45 = vpop.permute.xlu1 %1314 }
 0x25c   : > { %2419 = vmatmul.msk.bf16.vlgmr.msra.gmra.mxu3 %vm1174_vm6, %v1243_v38  ;;  %v1320_v46 = vsel %vm1174_vm6, %v1315_v45, 0 }
 0x25d   : > { %1399 = vmatpush.bf16.xpose.msrb.mxu3 %v1390_v44  ;;  %1329 = vmatpush.bf16.xpose.msrb.mxu0 %v1320_v46 }
 0x264   : > { %2421 = vmatmul.msk.bf16.vlgmr.msrb.gmra.mxu0 %vm1174_vm6, %v1313_v47 }
 0x26c   : > { %2423 = vmatmul.msk.bf16.vlgmr.msrb.gmra.mxu3 %vm1174_vm6, %v1383_v48 }
 0x2d1   : > { %v1190_v52 = vpop.f32.mrf.mxu1 }
 0x2d2   : > { %v1194_v53 = vsel %vm1087_vm7, %v1190_v52, -1e+20 }
 0x2d3   : > { %v1195_v54 = vsel %vm1174_vm6, %v1194_v53, -inf }
 0x2d4   : > { %1196 = vmax.xlane.f32.xlu1 %v1195_v54 }
 0x2d9   : > { %v1192_v55 = vpop.f32.mrf.mxu1 }
 0x2df   : > { %v1261_v56 = vpop.f32.mrf.mxu3 }
 0x2e0   : > { %v1265_v57 = vsel %vm1087_vm7, %v1261_v56, -1e+20 }
 0x2e1   : > { %v1331_v58 = vpop.f32.mrf.mxu0  ;;  %v1266_v59 = vsel %vm1174_vm6, %v1265_v57, -inf }
 0x2e2   : > { %1267 = vmax.xlane.f32.xlu2 %v1266_v59  ;;  %v1335_v60 = vsel %vm1087_vm7, %v1331_v58, -1e+20 }
 0x2e3   : > { %v1336_v63 = vsel %vm1174_vm6, %v1335_v60, -inf }
 0x2e7   : > { %v1263_v61 = vpop.f32.mrf.mxu3 }
 0x2e9   : > { %v1333_v62 = vpop.f32.mrf.mxu0 }
 0x2ea   : > { %1337 = vmax.xlane.f32.xlu2 %v1336_v63 }
 0x2ef   : > { %v1401_v0 = vpop.f32.mrf.mxu3 }
 0x2f0   : > { %v1405_v2 = vsel %vm1087_vm7, %v1401_v0, -1e+20 }
 0x2f1   : > { %v1406_v3 = vsel %vm1174_vm6, %v1405_v2, -inf }
 0x2f2   : > { %1407 = vmax.xlane.f32.xlu0 %v1406_v3 }
 0x2f7   : > { %v1403_v4 = vpop.f32.mrf.mxu3 }
 0x347   : > { %v1197_v5 = vpop.xlane.xlu1 %1196 }
 0x348   : > { %v1198_v6 = vsub.f32 %v1194_v53, %v1197_v5 }
 0x34a   : > { %v1199_v7 = vmul.f32 1.442695, %v1198_v6 }
 0x34c   : > { %2594 = vpow2.f32 %v1199_v7 }
 0x352   : > { %v2595_v8 = vpop.eup %2594 }
 0x353   : > { %v1201_v10 = vsel %vm1174_vm6, %v2595_v8, 0.0 }
 0x354   : > { %1202 = vadd.xlane.f32.xlu1 %v1201_v10 }
 0x355   : > { %v1268_v11 = vpop.xlane.xlu2 %1267 }
 0x356   : > { %v1269_v12 = vsub.f32 %v1265_v57, %v1268_v11 }
 0x358   : > { %v1270_v13 = vmul.f32 1.442695, %v1269_v12 }
 0x35a   : > { %2596 = vpow2.f32 %v1270_v13 }
 0x35d   : > { %v1338_v14 = vpop.xlane.xlu2 %1337 }
 0x35e   : > { %v1339_v15 = vsub.f32 %v1335_v60, %v1338_v14 }
 0x360   : > { %v3017_v16 = vpop.eup %2596  ;;  %v1340_v17 = vmul.f32 1.442695, %v1339_v15 }
 0x361   : > { %v1272_v18 = vsel %vm1174_vm6, %v3017_v16, 0.0 }
 0x362   : > { %2598 = vpow2.f32 %v1340_v17  ;;  %1273 = vadd.xlane.f32.xlu2 %v1272_v18 }
 0x365   : > { %v1408_v19 = vpop.xlane.xlu0 %1407 }
 0x366   : > { %v1409_v20 = vsub.f32 %v1405_v2, %v1408_v19 }
 0x368   : > { %v3021_v21 = vpop.eup %2598  ;;  %v1410_v22 = vmul.f32 1.442695, %v1409_v20 }
 0x369   : > { %v1342_v23 = vsel %vm1174_vm6, %v3021_v21, 0.0 }
 0x36a   : > { %2600 = vpow2.f32 %v1410_v22  ;;  %1343 = vadd.xlane.f32.xlu0 %v1342_v23 }
 0x36d   : > { %1220 = vrot.lane.b32.xlu1 %v2983_v36, %s2680_s12  ;;  %s3342_s12 = sld [smem:[#allocation14_spill]] }
 0x370   : > { %v3026_v24 = vpop.eup %2600 }
 0x371   : > { %v1412_v25 = vsel %vm1174_vm6, %v3026_v24, 0.0 }
 0x372   : > { %1413 = vadd.xlane.f32.xlu0 %v1412_v25 }
 0x375   : > { %1361 = vrot.lane.b32.xlu1 %v2983_v36, %s2681_s14  ;;  %s3333_s14 = scalar_lea.vmem %s3252_s8, %s2844_s2 }
 0x37a   : > { %1291 = vrot.lane.b32.xlu2 %v2983_v36, %s2682_s15 }
 0x386   : > { %1431 = vrot.lane.b32.xlu0 %v2983_v36, %s2683_s1  ;;  %s3334_s1 = scalar_lea.vmem %s3253_s9, %s2844_s2 }
 0x3c7   : > { %v1203_v26 = vpop.xlane.xlu1 %1202 }
 0x3c8   : > { %2602 = vrcp.f32 %v1203_v26  ;;  %v1215_v31 = vand.u32 2147483648, %v1203_v26  ;;  %vm1209_vm9 = vweird.f32 %v1203_v26  ;;  %v1213_v34 = vand.u32 2147483647, %v1203_v26 }
 0x3ca   : > { %v1216_v37 = vor.u32 1.1754944e-38, %v1215_v31  ;;  %vm1214_vm11 = vcmp.eq.f32.partialorder %v1213_v34, 8.507059e+37  ;;  %v2508_v34 = vld [vmem:[%s2882_s4 + $0x8] sm:$0xff] }
 0x3cb   : > { %1494 = vmatpush.bf16.msra.mxu0 %v2508_v34 }
 0x3ce   : > { %v2603_v27 = vpop.eup %2602 }
 0x3cf   : > { %v1205_v28 = vmul.f32 %v2603_v27, %v1203_v26  ;;  %vm1210_vm8 = vweird.f32 %v2603_v27 }
 0x3d0   : > { %vm1211_vm10 = vmor %vm1209_vm9, %vm1210_vm8 }
 0x3d1   : > { %v1206_v29 = vsub.f32 1.0, %v1205_v28 }
 0x3d3   : > { %v1207_v30 = vmul.f32 %v2603_v27, %v1206_v29 }
 0x3d5   : > { %v1274_v32 = vpop.xlane.xlu2 %1273  ;;  %v1208_v33 = vadd.f32 %v2603_v27, %v1207_v30 }
 0x3d6   : > { %2604 = vrcp.f32 %v1274_v32  ;;  %v1286_v51 = vand.u32 2147483648, %v1274_v32  ;;  %vm1280_vm14 = vweird.f32 %v1274_v32  ;;  %v1284_v54 = vand.u32 2147483647, %v1274_v32 }
 0x3d7   : > { %v1212_v35 = vsel %vm1211_vm10, %v2603_v27, %v1208_v33  ;;  %v1080_v27 = vld [vmem:[%s3332_s30] sm:$0xff]  ;;  %s3336_s30 = sld [smem:[#allocation10_spill]] }
 0x3d8   : > { %v1217_v38 = vsel %vm1214_vm11, %v1216_v37, %v1212_v35  ;;  %v1287_v60 = vor.u32 1.1754944e-38, %v1286_v51  ;;  %vm1285_vm2 = vcmp.eq.f32.partialorder %v1284_v54, 8.507059e+37  ;;  %v1504_v29 = vsel %vm1090_vm1, %v1080_v27, 0.0  ;;  %v2507_v35 = vld [vmem:[%s2882_s4] sm:$0xff] }
 0x3d9   : > { %v1218_v42 = vmul.f32 %v2595_v8, %v1217_v38  ;;  %1505 = vadd.xlane.f32.xlu0 %v1504_v29  ;;  %1495 = vmatpush.bf16.msra.mxu0 %v2507_v35  ;;  %vm1465_vm11 = vcmask 130048  }
 0x3db   : > { %v1219_v48 = vpack.c.bf16 %v1218_v42, %v1218_v42 }
 0x3dc   : > { %v2605_v39 = vpop.eup %2604 }
 0x3dd   : > { %v1276_v36 = vmul.f32 %v2605_v39, %v1274_v32  ;;  %v1344_v40 = vpop.xlane.xlu0 %1343  ;;  %v1292_v41 = vpop.permute.xlu2 %1291  ;;  %vm1281_vm13 = vweird.f32 %v2605_v39 }
 0x3de   : > { %2606 = vrcp.f32 %v1344_v40  ;;  %v1297_v47 = vsel %vm1225_vm12, %v1292_v41, 0  ;;  %vm1282_vm15 = vmor %vm1280_vm14, %vm1281_vm13  ;;  %v1356_v57 = vand.u32 2147483648, %v1344_v40  ;;  %v1354_v62 = vand.u32 2147483647, %v1344_v40 }
 0x3df   : > { %v1277_v43 = vsub.f32 1.0, %v1276_v36  ;;  %v1221_v44 = vpop.permute.xlu1 %1220  ;;  %vm1350_vm3 = vweird.f32 %v1344_v40  ;;  %vm1467_vm13 = vcmask 195584  }
 0x3e0   : > { %v1227_v45 = vsel %vm1225_vm12, %v1221_v44, 0  ;;  %v1357_v3 = vor.u32 1.1754944e-38, %v1356_v57  ;;  %vm1355_vm5 = vcmp.eq.f32.partialorder %v1354_v62, 8.507059e+37 }
 0x3e1   : > { %v1278_v46 = vmul.f32 %v2605_v39, %v1277_v43  ;;  %1236 = vmatpush.bf16.msra.mxu2 %v1227_v45 }
 0x3e3   : > { %v1279_v50 = vadd.f32 %v2605_v39, %v1278_v46 }
 0x3e4   : > { %v2607_v49 = vpop.eup %2606  ;;  %2418 = vmatmul.msk.bf16.vlgmr.msra.gmra.mxu2 %vm1174_vm6, %v1219_v48  ;;  %v2510_v48 = vld [vmem:[%s2908_s20 + $0x8] sm:$0xff] }
 0x3e5   : > { %1306 = vmatpush.bf16.msrb.mxu2 %v1297_v47  ;;  %v1346_v52 = vmul.f32 %v2607_v49, %v1344_v40  ;;  %v1414_v53 = vpop.xlane.xlu0 %1413  ;;  %v1283_v59 = vsel %vm1282_vm15, %v2605_v39, %v1279_v50  ;;  %vm1351_vm0 = vweird.f32 %v2607_v49 }
 0x3e6   : > { %2608 = vrcp.f32 %v1414_v53  ;;  %v1288_v0 = vsel %vm1285_vm2, %v1287_v60, %v1283_v59  ;;  %vm1352_vm4 = vmor %vm1350_vm3, %vm1351_vm0  ;;  %v1426_v15 = vand.u32 2147483648, %v1414_v53  ;;  %vm1420_vm8 = vweird.f32 %v1414_v53 }
 0x3e7   : > { %v1347_v55 = vsub.f32 1.0, %v1346_v52  ;;  %v1362_v56 = vpop.permute.xlu1 %1361  ;;  %v1289_v7 = vmul.f32 %v3017_v16, %v1288_v0  ;;  %v1424_v17 = vand.u32 2147483647, %v1414_v53  ;;  %v2580_v52 = vld [vmem:[%s3333_s14] ss:$0 sm:$0xff]  ;;  %s3337_s14 = sld [smem:[#allocation23_spill]] }
 0x3e8   : > { %v1367_v58 = vsel %vm1225_vm12, %v1362_v56, 0  ;;  %v1427_v16 = vor.u32 1.1754944e-38, %v1426_v15 }
 0x3e9   : > { %v1348_v61 = vmul.f32 %v2607_v49, %v1347_v55  ;;  %1376 = vmatpush.bf16.msrb.mxu1 %v1367_v58  ;;  %v1290_v13 = vpack.c.bf16 %v1289_v7, %v1289_v7  ;;  %vm1425_vm10 = vcmp.eq.f32.partialorder %v1424_v17, 8.507059e+37 }
 0x3eb   : > { %v1349_v63 = vadd.f32 %v2607_v49, %v1348_v61 }
 0x3ec   : > { %v2609_v2 = vpop.eup %2608 }
 0x3ed   : > { %v1416_v4 = vmul.f32 %v2609_v2, %v1414_v53  ;;  %v1353_v5 = vsel %vm1352_vm4, %v2607_v49, %v1349_v63  ;;  %vm1421_vm7 = vweird.f32 %v2609_v2  ;;  %1588 = vmatpush.bf16.msra.mxu1 %v2510_v48  ;;  %v2509_v49 = vld [vmem:[%s2908_s20] sm:$0xff]  ;;  %s3338_s20 = scalar_lea.vmem %s3337_s14, %s2844_s2  ;;  %s3350_s14 = sld [smem:[#allocation26_spill]] }
 0x3ee   : > { %v1358_v6 = vsel %vm1355_vm5, %v1357_v3, %v1353_v5  ;;  %vm1422_vm9 = vmor %vm1420_vm8, %vm1421_vm7 }
 0x3ef   : > { %v1417_v8 = vsub.f32 1.0, %v1416_v4  ;;  %v1359_v10 = vmul.f32 %v3021_v21, %v1358_v6  ;;  %v2582_v4 = vld [vmem:[%s3335_s18] ss:$0 sm:$0xff]  ;;  %s3341_s18 = sld [smem:[#allocation9_spill]] }
 0x3f1   : > { %v1418_v11 = vmul.f32 %v2609_v2, %v1417_v8  ;;  %v1360_v12 = vpack.c.bf16 %v1359_v10, %v1359_v10  ;;  %1589 = vmatpush.bf16.msra.mxu1 %v2509_v49 }
 0x3f3   : > { %2422 = vmatmul.msk.bf16.vlgmr.msrb.gmra.mxu1 %vm1174_vm6, %v1360_v12  ;;  %v1419_v14 = vadd.f32 %v2609_v2, %v1418_v11 }
 0x3f4   : > { %2420 = vmatmul.msk.bf16.vlgmr.msrb.gmra.mxu2 %vm1174_vm6, %v1290_v13 }
 0x3f5   : > { %v1423_v18 = vsel %vm1422_vm9, %v2609_v2, %v1419_v14  ;;  %v2583_v14 = vld [vmem:[%s3338_s20] ss:$0 sm:$0xff]  ;;  %s3351_s20 = scalar_lea.vmem %s3350_s14, %s2844_s2 }
 0x3f6   : > { %v1428_v21 = vsel %vm1425_vm10, %v1427_v16, %v1423_v18 }
 0x3f7   : > { %v1429_v22 = vmul.f32 %v3026_v24, %v1428_v21  ;;  %v2511_v21 = vld [vmem:[%s3336_s30] sm:$0xff] }
 0x3f8   : > { %v1432_v19 = vpop.permute.xlu0 %1431 }
 0x3f9   : > { %v1437_v20 = vsel %vm1225_vm12, %v1432_v19, 0  ;;  %v1430_v23 = vpack.c.bf16 %v1429_v22, %v1429_v22 }
 0x3fa   : > { %1446 = vmatpush.bf16.msra.mxu2 %v1437_v20  ;;  %v2512_v20 = vld [vmem:[%s3336_s30 + $0x8] sm:$0xff] }
 0x3fb   : > { %1625 = vmatpush.bf16.msra.mxu3 %v2512_v20 }
 0x3ff   : > { %1626 = vmatpush.bf16.msra.mxu3 %v2511_v21 }
 0x404   : > { %2424 = vmatmul.msk.bf16.vlgmr.msra.gmra.mxu2 %vm1174_vm6, %v1430_v23 }
 0x44c   : > { %v1506_v41 = vpop.xlane.xlu0 %1505 }
 0x44d   : > { %v1507_v43 = vmul.f32 %v1506_v41, %v2959_v9 }
 0x44f   : > { %v1508_v45 = vsub.f32 %v1080_v27, %v1507_v43 }
 0x451   : > { %v1509_v46 = vmul.f32 %v1508_v45, %v1508_v45 }
 0x453   : > { %v1510_v47 = vsel %vm1090_vm1, %v1509_v46, 0.0 }
 0x467   : > { %v1238_v25 = vpop.f32.mrf.mxu2 }
 0x46f   : > { %v1240_v26 = vpop.f32.mrf.mxu2 }
 0x470   : > { %v1378_v28 = vpop.f32.mrf.mxu1 }
 0x471   : > { %1457 = vrot.lane.b32.xlu1 %v1378_v28, %s2684_s3 }
 0x477   : > { %v1308_v24 = vpop.f32.mrf.mxu2 }
 0x478   : > { %1453 = vrot.lane.b32.xlu2 %v1308_v24, %s2685_s0  ;;  %v1380_v30 = vpop.f32.mrf.mxu1 }
 0x47f   : > { %v1310_v31 = vpop.f32.mrf.mxu2 }
 0x487   : > { %v1448_v32 = vpop.f32.mrf.mxu2 }
 0x488   : > { %1461 = vrot.lane.b32.xlu2 %v1448_v32, %s2686_s26 }
 0x48f   : > { %v1450_v33 = vpop.f32.mrf.mxu2 }
 0x4b1   : > { %1511 = vadd.xlane.f32.xlu2 %v1510_v47 }
 0x4d2   : > { %v1454_v37 = vpop.permute.xlu2 %1453 }
 0x4d3   : > { %v1464_v38 = vsel %vm1174_vm6, %v1238_v25, %v1454_v37 }
 0x4e2   : > { %v1462_v36 = vpop.permute.xlu2 %1461 }
 0x4e3   : > { %v1458_v39 = vpop.permute.xlu1 %1457 }
 0x4e4   : > { %v1466_v40 = vsel %vm1465_vm11, %v1464_v38, %v1458_v39 }
 0x4e5   : > { %v1468_v42 = vsel %vm1467_vm13, %v1466_v40, %v1462_v36 }
 0x4e6   : > { %v1469_v44 = vpack.c.bf16 %v1468_v42, %v1468_v42  ;;  %v2584_v42 = vld [vmem:[%s3340_s19] ss:$0 sm:$0xff] }
 0x4e8   : > { %2433 = vmatmul.msk.bf16.vlgmr.msra.gmra.mxu0 %vm1090_vm1, %v1469_v44 }
 0x524   : > { %v1512_v50 = vpop.xlane.xlu2 %1511 }
 0x525   : > { %v1513_v51 = vmul.f32 %v1512_v50, %v2959_v9 }
 0x527   : > { %v1514_v53 = vadd.f32 1e-05, %v1513_v51  ;;  %v2687_v51 = vmov 0  }
 0x529   : > { %2610 = vrsqrt.f32 %v1514_v53  ;;  %vm1521_vm14 = vweird.f32 %v1514_v53 }
 0x52f   : > { %v2611_v57 = vpop.eup %2610 }
 0x530   : > { %v1516_v59 = vmul.f32 %v2611_v57, %v1514_v53  ;;  %vm1522_vm15 = vweird.f32 %v2611_v57 }
 0x531   : > { %vm1523_vm0 = vmor %vm1521_vm14, %vm1522_vm15 }
 0x532   : > { %v1517_v61 = vmul.f32 %v2611_v57, %v1516_v59 }
 0x534   : > { %v1518_v62 = vmul.f32 0.5, %v1517_v61 }
 0x536   : > { %v1519_v63 = vsub.f32 1.5, %v1518_v62 }
 0x538   : > { %v1520_v0 = vmul.f32 %v2611_v57, %v1519_v63 }
 0x53a   : > { %v1524_v2 = vsel %vm1523_vm0, %v2611_v57, %v1520_v0 }
 0x53b   : > { %v1525_v3 = vmul.f32 %v1524_v2, %v1508_v45 }
 0x565   : > { %v1497_v54 = vpop.f32.mrf.mxu0 }
 0x566   : > { %v1498_v55 = vadd.f32 %v2580_v52, %v1497_v54 }
 0x568   : > { %v3070_v56 = vadd.f32 %v1498_v55, %v2955_v1  ;;  %v2581_v1 = vld [vmem:[%s3334_s1] ss:$0 sm:$0xff] }
 0x569   : > { %v1529_v5 = vmul.f32 %v2581_v1, %v1525_v3 }
 0x56a   : > { %v1534_v58 = vsel %vm1090_vm1, %v3070_v56, 0.0 }
 0x56b   : > { %1535 = vadd.xlane.f32.xlu1 %v1534_v58  ;;  %v1533_v6 = vadd.f32 %v2582_v4, %v1529_v5 }
 0x56d   : > { %v1499_v60 = vpop.f32.mrf.mxu0  ;;  %v1558_v7 = vpack.c.bf16 %v1533_v6, %v1533_v6 }
 0x56f   : > { %2442 = vmatmul.msk.bf16.vlgmr.msra.gmra.mxu1 %vm1090_vm1, %v1558_v7 }
 0x5de   : > { %v1536_v8 = vpop.xlane.xlu1 %1535 }
 0x5df   : > { %v1537_v10 = vmul.f32 %v1536_v8, %v2959_v9 }
 0x5e1   : > { %v1538_v11 = vsub.f32 %v3070_v56, %v1537_v10 }
 0x5e3   : > { %v1539_v12 = vmul.f32 %v1538_v11, %v1538_v11 }
 0x5e5   : > { %v1540_v13 = vsel %vm1090_vm1, %v1539_v12, 0.0 }
 0x5e6   : > { %1541 = vadd.xlane.f32.xlu0 %v1540_v13 }
 0x5ec   : > { %v1591_v15 = vpop.f32.mrf.mxu1 }
 0x5ed   : > { %v1592_v17 = vadd.f32 %v2583_v14, %v1591_v15 }
 0x5ef   : > { %v3093_v18 = vpack.c.bf16 %v1592_v17, %v1592_v17 }
 0x5f1   : > { %1712 = vrot.lane.b32.xlu1 %v3093_v18, %s2674_s23  ;;  %v1643_v19 = vsel %vm1174_vm6, %v3093_v18, 0 }
 0x5f2   : > { %1652 = vmatpush.bf16.xpose.msrb.mxu2 %v1643_v19 }
 0x5f4   : > { %v1593_v16 = vpop.f32.mrf.mxu1 }
 0x5f9   : > { %1852 = vrot.lane.b32.xlu1 %v3093_v18, %s2673_s25 }
 0x5fa   : > { %1782 = vrot.lane.b32.xlu0 %v3093_v18, %s2678_s28 }
 0x659   : > { %v1542_v22 = vpop.xlane.xlu0 %1541 }
 0x65a   : > { %v1543_v23 = vmul.f32 %v1542_v22, %v2959_v9 }
 0x65c   : > { %v1544_v25 = vadd.f32 1e-05, %v1543_v23 }
 0x65e   : > { %2612 = vrsqrt.f32 %v1544_v25  ;;  %vm1551_vm3 = vweird.f32 %v1544_v25 }
 0x663   : > { %v1713_v34 = vpop.permute.xlu1 %1712 }
 0x664   : > { %v2613_v26 = vpop.eup %2612  ;;  %v1718_v37 = vsel %vm1174_vm6, %v1713_v34, 0 }
 0x665   : > { %v1546_v27 = vmul.f32 %v2613_v26, %v1544_v25  ;;  %vm1552_vm2 = vweird.f32 %v2613_v26  ;;  %1727 = vmatpush.bf16.xpose.msrb.mxu1 %v1718_v37 }
 0x666   : > { %vm1553_vm4 = vmor %vm1551_vm3, %vm1552_vm2 }
 0x667   : > { %v1547_v28 = vmul.f32 %v2613_v26, %v1546_v27 }
 0x669   : > { %v1548_v29 = vmul.f32 0.5, %v1547_v28 }
 0x66b   : > { %v1549_v24 = vsub.f32 1.5, %v1548_v29  ;;  %v1853_v40 = vpop.permute.xlu1 %1852 }
 0x66c   : > { %v1783_v35 = vpop.permute.xlu0 %1782  ;;  %v1858_v41 = vsel %vm1174_vm6, %v1853_v40, 0 }
 0x66d   : > { %v1550_v30 = vmul.f32 %v2613_v26, %v1549_v24  ;;  %v1788_v38 = vsel %vm1174_vm6, %v1783_v35, 0  ;;  %1867 = vmatpush.bf16.xpose.msra.mxu1 %v1858_v41 }
 0x66e   : > { %1797 = vmatpush.bf16.xpose.msra.mxu2 %v1788_v38 }
 0x66f   : > { %v1554_v31 = vsel %vm1553_vm4, %v2613_v26, %v1550_v30 }
 0x670   : > { %v1555_v32 = vmul.f32 %v1554_v31, %v1538_v11 }
 0x672   : > { %v1556_v33 = vmul.f32 %v2581_v1, %v1555_v32 }
 0x674   : > { %v1557_v39 = vadd.f32 %v2582_v4, %v1556_v33 }
 0x676   : > { %v1595_v36 = vpack.c.bf16 %v1557_v39, %v1557_v39 }
 0x678   : > { %2451 = vmatmul.msk.bf16.vlgmr.msra.gmra.mxu3 %vm1090_vm1, %v1595_v36 }
 0x6fb   : > { %v1628_v43 = vpop.f32.mrf.mxu3 }
 0x6fc   : > { %v1629_v44 = vadd.f32 %v2584_v42, %v1628_v43 }
 0x6fe   : > { %v1637_v45 = vpack.c.bf16 %v1629_v44, %v1629_v44 }
 0x700   : > { %1710 = vrot.lane.b32.xlu2 %v1637_v45, %s2674_s23  ;;  %1780 = vrot.lane.b32.xlu0 %v1637_v45, %s2678_s28  ;;  %s3343_s23 = scalar_lea.vmem %s3342_s12, %s3341_s18 }
 0x701   : > { %2452 = vmatmul.msk.bf16.vlgmr.msrb.gmra.mxu2 %vm1174_vm6, %v1637_v45  ;;  %v1081_v50 = vld [vmem:[%s3343_s23] sm:$0x1] }
 0x702   : > { %vm1082_vm5 = vcmp.ne.f32.partialorder %v1081_v50, 0.0 }
 0x703   : > { %v1630_v46 = vpop.f32.mrf.mxu3  ;;  %v1658_v52 = vsel %vm1082_vm5, 1, %v2687_v51 }
 0x704   : > { %v1659_v53 = vperm.slane %v1658_v52, 0 }
 0x706   : > { %vm3127_vm7 = vcmp.eq.s32.totalorder %v1659_v53, 1 }
 0x708   : > { %1850 = vrot.lane.b32.xlu2 %v1637_v45, %s2673_s25  ;;  %s3346_s25 = sld [smem:[#allocation11_spill]] }
 0x75a   : > { %v1711_v47 = vpop.permute.xlu2 %1710 }
 0x75b   : > { %2454 = vmatmul.msk.bf16.vlgmr.msrb.gmra.mxu1 %vm1174_vm6, %v1711_v47 }
 0x762   : > { %v1851_v48 = vpop.permute.xlu2 %1850 }
 0x76b   : > { %2458 = vmatmul.msk.bf16.vlgmr.msra.gmra.mxu1 %vm1174_vm6, %v1851_v48 }
 0x772   : > { %v1781_v49 = vpop.permute.xlu0 %1780 }
 0x773   : > { %2456 = vmatmul.msk.bf16.vlgmr.msra.gmra.mxu2 %vm1174_vm6, %v1781_v49 }
 0x784   : > { %v1654_v55 = vpop.f32.mrf.mxu2 }
 0x785   : > { %v1661_v57 = vsel %vm3127_vm7, %v1654_v55, -1e+20 }
 0x786   : > { %v1662_v58 = vsel %vm1174_vm6, %v1661_v57, -inf }
 0x787   : > { %1663 = vmax.xlane.f32.xlu0 %v1662_v58 }
 0x78c   : > { %v1656_v59 = vpop.f32.mrf.mxu2 }
 0x79b   : > { %1759 = vrot.lane.b32.xlu0 %v3093_v18, %s2677_s27  ;;  %s3347_s27 = sld [smem:[#allocation25_spill]] }
 0x7a1   : > { %s3348_s28 = scalar_lea.vmem %s3347_s27, %s2844_s2 }
 0x7d8   : > { %v1729_v60 = vpop.f32.mrf.mxu1 }
 0x7d9   : > { %v1733_v61 = vsel %vm3127_vm7, %v1729_v60, -1e+20 }
 0x7da   : > { %v1734_v62 = vsel %vm1174_vm6, %v1733_v61, -inf }
 0x7db   : > { %1735 = vmax.xlane.f32.xlu1 %v1734_v62 }
 0x7e0   : > { %v1731_v63 = vpop.f32.mrf.mxu1 }
 0x7e8   : > { %v1869_v0 = vpop.f32.mrf.mxu1 }
 0x7e9   : > { %v1873_v1 = vsel %vm3127_vm7, %v1869_v0, -1e+20 }
 0x7ea   : > { %v1874_v2 = vsel %vm1174_vm6, %v1873_v1, -inf }
 0x7eb   : > { %1875 = vmax.xlane.f32.xlu2 %v1874_v2 }
 0x7f0   : > { %v1871_v3 = vpop.f32.mrf.mxu1 }
 0x7f6   : > { %v1799_v4 = vpop.f32.mrf.mxu2 }
 0x7f7   : > { %v1803_v5 = vsel %vm3127_vm7, %v1799_v4, -1e+20 }
 0x7f8   : > { %v1804_v6 = vsel %vm1174_vm6, %v1803_v5, -inf }
 0x7f9   : > { %1805 = vmax.xlane.f32.xlu1 %v1804_v6 }
 0x7fa   : > { %v1664_v7 = vpop.xlane.xlu0 %1663 }
 0x7fb   : > { %v1665_v8 = vsub.f32 %v1661_v57, %v1664_v7 }
 0x7fd   : > { %v1666_v10 = vmul.f32 1.442695, %v1665_v8 }
 0x7fe   : > { %v1801_v11 = vpop.f32.mrf.mxu2 }
 0x7ff   : > { %2614 = vpow2.f32 %v1666_v10 }
 0x805   : > { %v3145_v12 = vpop.eup %2614 }
 0x806   : > { %v1668_v13 = vsel %vm1174_vm6, %v3145_v12, 0.0 }
 0x807   : > { %1669 = vadd.xlane.f32.xlu2 %v1668_v13 }
 0x80d   : > { %v1760_v14 = vpop.permute.xlu0 %1759 }
 0x80e   : > { %v1765_v15 = vsel %vm1225_vm12, %v1760_v14, 0 }
 0x80f   : > { %1774 = vmatpush.bf16.msrb.mxu3 %v1765_v15 }
 0x84e   : > { %v1736_v17 = vpop.xlane.xlu1 %1735 }
 0x84f   : > { %v1737_v19 = vsub.f32 %v1733_v61, %v1736_v17 }
 0x851   : > { %v1738_v16 = vmul.f32 1.442695, %v1737_v19 }
 0x853   : > { %2616 = vpow2.f32 %v1738_v16 }
 0x859   : > { %v2617_v20 = vpop.eup %2616 }
 0x85a   : > { %v1740_v21 = vsel %vm1174_vm6, %v2617_v20, 0.0 }
 0x85b   : > { %1741 = vadd.xlane.f32.xlu0 %v1740_v21 }
 0x85e   : > { %v1876_v22 = vpop.xlane.xlu2 %1875 }
 0x85f   : > { %v1877_v23 = vsub.f32 %v1873_v1, %v1876_v22 }
 0x861   : > { %v1878_v25 = vmul.f32 1.442695, %v1877_v23 }
 0x863   : > { %2618 = vpow2.f32 %v1878_v25 }
 0x869   : > { %v3151_v26 = vpop.eup %2618 }
 0x86a   : > { %v1880_v27 = vsel %vm1174_vm6, %v3151_v26, 0.0 }
 0x86b   : > { %1881 = vadd.xlane.f32.xlu1 %v1880_v27 }
 0x86c   : > { %v1806_v28 = vpop.xlane.xlu1 %1805 }
 0x86d   : > { %v1807_v29 = vsub.f32 %v1803_v5, %v1806_v28 }
 0x86f   : > { %v1808_v24 = vmul.f32 1.442695, %v1807_v29  ;;  %1829 = vrot.lane.b32.xlu0 %v3093_v18, %s2679_s11 }
 0x871   : > { %2620 = vpow2.f32 %v1808_v24 }
 0x877   : > { %v3157_v30 = vpop.eup %2620 }
 0x878   : > { %v1810_v31 = vsel %vm1174_vm6, %v3157_v30, 0.0 }
 0x879   : > { %1811 = vadd.xlane.f32.xlu2 %v1810_v31 }
 0x87a   : > { %v1670_v33 = vpop.xlane.xlu2 %1669 }
 0x87b   : > { %v1682_v58 = vand.u32 2147483648, %v1670_v33  ;;  %vm1676_vm3 = vweird.f32 %v1670_v33  ;;  %v1680_v61 = vand.u32 2147483647, %v1670_v33 }
 0x87d   : > { %v1683_v1 = vor.u32 1.1754944e-38, %v1682_v58  ;;  %v2520_v58 = vld [vmem:[%s2944_s16 + $0x18] sm:$0xff] }
 0x87e   : > { %2083 = vmatpush.bf16.msrb.mxu1 %v2520_v58 }
 0x884   : > { %1688 = vrot.lane.b32.xlu1 %v3093_v18, %s2675_s21 }
 0x891   : > { %1899 = vrot.lane.b32.xlu2 %v3093_v18, %s2676_s13 }
 0x8ce   : > { %v1742_v32 = vpop.xlane.xlu0 %1741 }
 0x8cf   : > { %2622 = vrcp.f32 %v1742_v32  ;;  %v1754_v38 = vand.u32 2147483648, %v1742_v32  ;;  %v1752_v36 = vand.u32 2147483647, %v1742_v32  ;;  %vm1748_vm9 = vweird.f32 %v1742_v32 }
 0x8d0   : > { %2624 = vrcp.f32 %v1670_v33 }
 0x8d1   : > { %v1755_v42 = vor.u32 1.1754944e-38, %v1754_v38  ;;  %vm1753_vm14 = vcmp.eq.f32.partialorder %v1752_v36, 8.507059e+37  ;;  %v2513_v38 = vld [vmem:[%s3346_s25] sm:$0xff] }
 0x8d5   : > { %v2623_v34 = vpop.eup %2622 }
 0x8d6   : > { %v1744_v35 = vmul.f32 %v2623_v34, %v1742_v32  ;;  %vm1749_vm8 = vweird.f32 %v2623_v34  ;;  %v2625_v40 = vpop.eup %2624 }
 0x8d7   : > { %vm1750_vm10 = vmor %vm1748_vm9, %vm1749_vm8  ;;  %v1672_v18 = vmul.f32 %v2625_v40, %v1670_v33  ;;  %vm1677_vm0 = vweird.f32 %v2625_v40  ;;  %vm1681_vm8 = vcmp.eq.f32.partialorder %v1680_v61, 8.507059e+37 }
 0x8d8   : > { %v1745_v37 = vsub.f32 1.0, %v1744_v35  ;;  %vm1678_vm5 = vmor %vm1676_vm3, %vm1677_vm0 }
 0x8d9   : > { %v1673_v48 = vsub.f32 1.0, %v1672_v18  ;;  %v2585_v18 = vld [vmem:[%s3348_s28] ss:$0 sm:$0xff] }
 0x8da   : > { %v1746_v39 = vmul.f32 %v2623_v34, %v1745_v37 }
 0x8db   : > { %v1674_v51 = vmul.f32 %v2625_v40, %v1673_v48 }
 0x8dc   : > { %v1747_v41 = vadd.f32 %v2623_v34, %v1746_v39 }
 0x8dd   : > { %v1675_v55 = vadd.f32 %v2625_v40, %v1674_v51 }
 0x8de   : > { %v1751_v43 = vsel %vm1750_vm10, %v2623_v34, %v1747_v41  ;;  %v1882_v44 = vpop.xlane.xlu1 %1881 }
 0x8df   : > { %v1756_v45 = vsel %vm1753_vm14, %v1755_v42, %v1751_v43  ;;  %2626 = vrcp.f32 %v1882_v44  ;;  %v1894_v54 = vand.u32 2147483648, %v1882_v44  ;;  %v1892_v57 = vand.u32 2147483647, %v1882_v44 }
 0x8e0   : > { %v1757_v46 = vmul.f32 %v2617_v20, %v1756_v45  ;;  %vm1888_vm2 = vweird.f32 %v1882_v44  ;;  %v1679_v0 = vsel %vm1678_vm5, %v2625_v40, %v1675_v55  ;;  %v2516_v55 = vld [vmem:[%s2934_s29 + $0x8] sm:$0xff] }
 0x8e1   : > { %v1895_v63 = vor.u32 1.1754944e-38, %v1894_v54  ;;  %vm1893_vm7 = vcmp.eq.f32.partialorder %v1892_v57, 8.507059e+37  ;;  %v1684_v3 = vsel %vm1681_vm8, %v1683_v1, %v1679_v0  ;;  %v1830_v10 = vpop.permute.xlu0 %1829  ;;  %v2515_v57 = vld [vmem:[%s2934_s29] sm:$0xff] }
 0x8e2   : > { %v1758_v47 = vpack.c.bf16 %v1757_v46, %v1757_v46  ;;  %v1685_v8 = vmul.f32 %v3145_v12, %v1684_v3  ;;  %v1835_v19 = vsel %vm1225_vm12, %v1830_v10, 0 }
 0x8e4   : > { %2455 = vmatmul.msk.bf16.vlgmr.msrb.gmra.mxu3 %vm1174_vm6, %v1758_v47  ;;  %v1686_v20 = vpack.c.bf16 %v1685_v8, %v1685_v8 }
 0x8e5   : > { %v2627_v49 = vpop.eup %2626 }
 0x8e6   : > { %v1884_v50 = vmul.f32 %v2627_v49, %v1882_v44  ;;  %vm1889_vm15 = vweird.f32 %v2627_v49 }
 0x8e7   : > { %vm1890_vm4 = vmor %vm1888_vm2, %vm1889_vm15 }
 0x8e8   : > { %v1885_v52 = vsub.f32 1.0, %v1884_v50 }
 0x8ea   : > { %v1886_v53 = vmul.f32 %v2627_v49, %v1885_v52 }
 0x8ec   : > { %v1887_v59 = vadd.f32 %v2627_v49, %v1886_v53  ;;  %v1812_v60 = vpop.xlane.xlu2 %1811 }
 0x8ed   : > { %2628 = vrcp.f32 %v1812_v60  ;;  %v1824_v12 = vand.u32 2147483648, %v1812_v60  ;;  %vm1818_vm10 = vweird.f32 %v1812_v60  ;;  %v1822_v22 = vand.u32 2147483647, %v1812_v60 }
 0x8ee   : > { %v1891_v62 = vsel %vm1890_vm4, %v2627_v49, %v1887_v59 }
 0x8ef   : > { %v1896_v2 = vsel %vm1893_vm7, %v1895_v63, %v1891_v62  ;;  %v1825_v25 = vor.u32 1.1754944e-38, %v1824_v12  ;;  %vm1823_vm15 = vcmp.eq.f32.partialorder %v1822_v22, 8.507059e+37 }
 0x8f0   : > { %v1897_v5 = vmul.f32 %v3151_v26, %v1896_v2 }
 0x8f2   : > { %v1898_v17 = vpack.c.bf16 %v1897_v5, %v1897_v5 }
 0x8f3   : > { %v2629_v4 = vpop.eup %2628 }
 0x8f4   : > { %v1814_v6 = vmul.f32 %v2629_v4, %v1812_v60  ;;  %v1900_v7 = vpop.permute.xlu2 %1899  ;;  %vm1819_vm9 = vweird.f32 %v2629_v4  ;;  %v2519_v60 = vld [vmem:[%s2944_s16 + $0x10] sm:$0xff] }
 0x8f5   : > { %v1905_v11 = vsel %vm1225_vm12, %v1900_v7, 0  ;;  %vm1820_vm14 = vmor %vm1818_vm10, %vm1819_vm9  ;;  %2084 = vmatpush.bf16.msrb.mxu1 %v2519_v60 }
 0x8f6   : > { %v1815_v13 = vsub.f32 1.0, %v1814_v6  ;;  %1914 = vmatpush.bf16.msra.mxu3 %v1905_v11  ;;  %v1689_v14 = vpop.permute.xlu1 %1688  ;;  %v2587_v6 = vld [vmem:[%s3351_s20] ss:$0 sm:$0xff]  ;;  %v2518_v11 = vld [vmem:[%s2944_s16 + $0x8] sm:$0xff] }
 0x8f7   : > { %v1694_v15 = vsel %vm1225_vm12, %v1689_v14, 0  ;;  %v2588_v14 = vld [vmem:[%s1058_s24] ss:$0 sm:$0xff] }
 0x8f8   : > { %v1816_v16 = vmul.f32 %v2629_v4, %v1815_v13  ;;  %1703 = vmatpush.bf16.msrb.mxu0 %v1694_v15  ;;  %v2517_v13 = vld [vmem:[%s2944_s16] sm:$0xff]  ;;  %s3354_s16 = sld [smem:[#allocation3_spill]] }
 0x8f9   : > { %2459 = vmatmul.msk.bf16.vlgmr.msra.gmra.mxu3 %vm1174_vm6, %v1898_v17  ;;  %2085 = vmatpush.bf16.msrb.mxu1 %v2518_v11 }
 0x8fa   : > { %v1817_v21 = vadd.f32 %v2629_v4, %v1816_v16 }
 0x8fb   : > { %2453 = vmatmul.msk.bf16.vlgmr.msrb.gmra.mxu0 %vm1174_vm6, %v1686_v20 }
 0x8fc   : > { %1844 = vmatpush.bf16.msra.mxu0 %v1835_v19  ;;  %v1821_v23 = vsel %vm1820_vm14, %v2629_v4, %v1817_v21  ;;  %v2589_v21 = vld [vmem:[%s1066_s7] ss:$0 sm:$0xff] }
 0x8fd   : > { %v1826_v26 = vsel %vm1823_vm15, %v1825_v25, %v1821_v23  ;;  %2086 = vmatpush.bf16.msrb.mxu1 %v2517_v13 }
 0x8fe   : > { %v1827_v27 = vmul.f32 %v3157_v30, %v1826_v26  ;;  %v2514_v30 = vld [vmem:[%s3346_s25 + $0x8] sm:$0xff]  ;;  %p2495_p8 = scmp.ne.s32.totalorder %s3354_s16, 1 }
 0x8ff   : > { %1960 = vmatpush.bf16.msrb.mxu2 %v2514_v30 }
 0x900   : > { %v1828_v28 = vpack.c.bf16 %v1827_v27, %v1827_v27  ;;  %2030 = vmatpush.bf16.msrb.mxu0 %v2516_v55 }
 0x903   : > { %1961 = vmatpush.bf16.msrb.mxu2 %v2513_v38 }
 0x904   : > { %2031 = vmatpush.bf16.msrb.mxu0 %v2515_v57 }
 0x90b   : > { %2457 = vmatmul.msk.bf16.vlgmr.msra.gmra.mxu0 %vm1174_vm6, %v1828_v28 }
 0x967   : > { %v1776_v29 = vpop.f32.mrf.mxu3 }
 0x968   : > { %1921 = vrot.lane.b32.xlu0 %v1776_v29, %s2685_s0 }
 0x96f   : > { %v1778_v24 = vpop.f32.mrf.mxu3 }
 0x978   : > { %v1705_v31 = vpop.f32.mrf.mxu0 }
 0x97c   : > { %v1916_v32 = vpop.f32.mrf.mxu3 }
 0x97d   : > { %1929 = vrot.lane.b32.xlu2 %v1916_v32, %s2686_s26 }
 0x980   : > { %v1707_v33 = vpop.f32.mrf.mxu0 }
 0x984   : > { %v1918_v34 = vpop.f32.mrf.mxu3 }
 0x988   : > { %v1846_v35 = vpop.f32.mrf.mxu0 }
 0x989   : > { %1925 = vrot.lane.b32.xlu1 %v1846_v35, %s2684_s3  ;;  %s3349_s3 = scalar_lea.vmem %s3261_s17, %s2844_s2 }
 0x990   : > { %v1848_v37 = vpop.f32.mrf.mxu0 }
 0x9d7   : > { %v1930_v41 = vpop.permute.xlu2 %1929 }
 0x9da   : > { %v1922_v39 = vpop.permute.xlu0 %1921 }
 0x9db   : > { %v1932_v36 = vsel %vm1174_vm6, %v1705_v31, %v1922_v39 }
 0x9fb   : > { %v1926_v40 = vpop.permute.xlu1 %1925 }
 0x9fc   : > { %v1933_v42 = vsel %vm1465_vm11, %v1932_v36, %v1926_v40 }
 0x9fd   : > { %v1934_v43 = vsel %vm1467_vm13, %v1933_v42, %v1930_v41  ;;  %vm2075_vm13 = vcmask 523264  }
 0x9fe   : > { %v1935_v44 = vpack.c.bf16 %v1934_v43, %v1934_v43 }
 0xa00   : > { %2468 = vmatmul.msk.bf16.vlgmr.msrb.gmra.mxu2 %vm1090_vm1, %v1935_v44 }
 0xa83   : > { %v1963_v45 = vpop.f32.mrf.mxu2 }
 0xa84   : > { %v1964_v46 = vadd.f32 %v2585_v18, %v1963_v45 }
 0xa86   : > { %v1967_v47 = vadd.f32 %v1964_v46, %v3070_v56 }
 0xa88   : > { %v1970_v48 = vsel %vm1090_vm1, %v1967_v47, 0.0 }
 0xa89   : > { %1971 = vadd.xlane.f32.xlu0 %v1970_v48 }
 0xa8b   : > { %v1965_v49 = vpop.f32.mrf.mxu2 }
 0xafc   : > { %v1972_v50 = vpop.xlane.xlu0 %1971 }
 0xafd   : > { %v1973_v51 = vmul.f32 %v1972_v50, %v2959_v9 }
 0xaff   : > { %v1974_v52 = vsub.f32 %v1967_v47, %v1973_v51 }
 0xb01   : > { %v1975_v53 = vmul.f32 %v1974_v52, %v1974_v52 }
 0xb03   : > { %v1976_v54 = vsel %vm1090_vm1, %v1975_v53, 0.0 }
 0xb04   : > { %1977 = vadd.xlane.f32.xlu1 %v1976_v54 }
 0xb77   : > { %v1978_v56 = vpop.xlane.xlu1 %1977 }
 0xb78   : > { %v1979_v59 = vmul.f32 %v1978_v56, %v2959_v9  ;;  %v2586_v9 = vld [vmem:[%s3349_s3] ss:$0 sm:$0xff] }
 0xb7a   : > { %v1980_v61 = vadd.f32 1e-05, %v1979_v59 }
 0xb7c   : > { %2630 = vrsqrt.f32 %v1980_v61  ;;  %vm1987_vm12 = vweird.f32 %v1980_v61 }
 0xb82   : > { %v2631_v62 = vpop.eup %2630 }
 0xb83   : > { %v1982_v63 = vmul.f32 %v2631_v62, %v1980_v61  ;;  %vm1988_vm6 = vweird.f32 %v2631_v62 }
 0xb84   : > { %vm1989_vm11 = vmor %vm1987_vm12, %vm1988_vm6 }
 0xb85   : > { %v1983_v0 = vmul.f32 %v2631_v62, %v1982_v63 }
 0xb87   : > { %v1984_v1 = vmul.f32 0.5, %v1983_v0 }
 0xb89   : > { %v1985_v2 = vsub.f32 1.5, %v1984_v1 }
 0xb8b   : > { %v1986_v3 = vmul.f32 %v2631_v62, %v1985_v2 }
 0xb8d   : > { %v1990_v4 = vsel %vm1989_vm11, %v2631_v62, %v1986_v3 }
 0xb8e   : > { %v1991_v5 = vmul.f32 %v1990_v4, %v1974_v52 }
 0xb90   : > { %v1995_v7 = vmul.f32 %v2586_v9, %v1991_v5 }
 0xb92   : > { %v1999_v8 = vadd.f32 %v2587_v6, %v1995_v7 }
 0xb94   : > { %v2000_v10 = vpack.c.bf16 %v1999_v8, %v1999_v8 }
 0xb96   : > { %2477 = vmatmul.msk.bf16.vlgmr.msrb.gmra.mxu0 %vm1090_vm1, %v2000_v10 }
 0xc13   : > { %v2033_v15 = vpop.f32.mrf.mxu0 }
 0xc14   : > { %v2034_v17 = vadd.f32 %v2588_v14, %v2033_v15 }
 0xc16   : > { %v2037_v19 = vmax.f32 %v2034_v17, 0.0 }
 0xc18   : > { %v2038_v16 = vpack.c.bf16 %v2037_v19, %v2037_v19 }
 0xc1a   : > { %2494 = vmatmul.msk.bf16.vlgmr.msrb.gmra.mxu1 %vm2075_vm13, %v2038_v16 }
 0xc1b   : > { %v2035_v20 = vpop.f32.mrf.mxu0 }
 0xc97   : > { %v2088_v12 = vpop.f32.mrf.mxu1 }
 0xc98   : > { %v2089_v22 = vadd.f32 %v2589_v21, %v2088_v12 }
 0xc9a   : > { %v2092_v23 = vadd.f32 %v2089_v22, %v1967_v47 }
 0xc9b   : > { %2097 = sbr.rel (%p2495_p8) target bundleno = 3233 (0xca1), region = 120 }
 0xc9c   : > { %2093 = vst.msk [vmem:[#allocation2] sm:$0xff] %vm1090_vm1, %v2092_v23 }
 0xc9f   : > { %v2090_v25 = vpop.f32.mrf.mxu1 }
 0xca0   : > { %2098 = vst.msk [vmem:[%s1070_s22] sm:$0xff] %vm1090_vm1, %v2092_v23 }
 0xca1 PF: > { %s3356_s2 = sld [smem:[#allocation6_spill]] }
 0xca2   : > { %s3357_s4 = sld [smem:[#allocation4_spill]] }
 0xca3   : > { %s3358_s30 = sld [smem:[#allocation5_spill]] }
 0xca4   : > { %s3359_s24 = sld [smem:[#allocation7_spill]] }
 0xca5   : > { %s3360_s25 = sld [smem:[#allocation8_spill]] }
 0xca7   : > { %s33_s5 = sadd.s32 1, %s3356_s2  }
 0xca8   : > { %p30_p9 = scmp.ge.s32.totalorder %s33_s5, 6  }
 0xcaa   :  { %32 = sbr.rel (!%p30_p9) target bundleno = 21 (0x15), region = 216 }

</bundles_post_ra>
